<compile_context>
chip_gen: v7x
topology: tpu7x:2x2x1
jax: 0.10.0
libtpu: 0.0.40
codegen_flags: <defaults>
</compile_context>

<pallas_src>
import functools

import jax
import jax.numpy as jnp
from jax.experimental import pallas as pl
from jax.experimental.pallas import tpu as pltpu

_LANE = 128  # TPU lane width; all feature dims are padded to this boundary.


def _round_up(x, m):
    return ((x + m - 1) // m) * m


# ----------------------------------------------------------------------------- kernel
def _mha_flash_kernel(latent_ref, data_ref,
                      wq_ref, bq_ref, wk_ref, bk_ref, wv_ref, bv_ref,
                      wo_ref, bo_ref,
                      out_ref,
                      q_scr, m_scr, l_scr, acc_scr,
                      *, num_heads, head_dim_p):
    Bt, Nq, Ldp = latent_ref.shape
    _, Tk, Ddp = data_ref.shape
    H = num_heads
    hdp = head_dim_p
    inner_p = H * hdp

    kv = pl.program_id(1)
    n_kv = pl.num_programs(1)

    @pl.when(kv == 0)
    def _init():
        # Q projection once per batch block (scale already folded into wq / bq).
        lat2 = latent_ref[...].reshape(Bt * Nq, Ldp).astype(jnp.bfloat16)
        q = jnp.dot(lat2, wq_ref[...], preferred_element_type=jnp.float32) + bq_ref[...]
        q_scr[...] = q.reshape(Bt, Nq, inner_p).astype(q_scr.dtype)
        m_scr[...] = jnp.full(m_scr.shape, -jnp.inf, dtype=m_scr.dtype)
        l_scr[...] = jnp.zeros(l_scr.shape, dtype=l_scr.dtype)
        acc_scr[...] = jnp.zeros(acc_scr.shape, dtype=acc_scr.dtype)

    # K/V projections for this KV tile, fused over heads (single wide matmuls).
    dat2 = data_ref[...].reshape(Bt * Tk, Ddp).astype(jnp.bfloat16)
    k = jnp.dot(dat2, wk_ref[...], preferred_element_type=jnp.float32) + bk_ref[...]
    v = jnp.dot(dat2, wv_ref[...], preferred_element_type=jnp.float32) + bv_ref[...]
    k = k.reshape(Bt, Tk, inner_p).astype(jnp.bfloat16)
    v = v.reshape(Bt, Tk, inner_p).astype(jnp.bfloat16)

    # Online-softmax update per head. head_dim is padded to a 128 multiple, so every
    # slice below is a whole-vreg, lane-aligned selection -> no relayout traffic.
    # (H is small and static -> fully unrolled.)
    for h in range(H):
        lo = h * hdp
        qh = q_scr[:, :, lo:lo + hdp]                       # (Bt, Nq, hdp) bf16
        kh = k[:, :, lo:lo + hdp]                           # (Bt, Tk, hdp) bf16
        vh = v[:, :, lo:lo + hdp]                           # (Bt, Tk, hdp) bf16

        s = jnp.einsum('bqd,bkd->bqk', qh, kh,
                       preferred_element_type=jnp.float32)  # (Bt, Nq, Tk) f32
        # TODO(synk): optional `mask` argument of the PyTorch forward not implemented
        #             (would be an additive -1e9 fill on `s` here).
        m_prev = m_scr[h]                                    # (Bt, Nq, 1)
        m_new = jnp.maximum(m_prev, jnp.max(s, axis=-1, keepdims=True))
        alpha = jnp.exp(m_prev - m_new)
        p = jnp.exp(s - m_new)
        l_scr[h] = alpha * l_scr[h] + jnp.sum(p, axis=-1, keepdims=True)
        acc_scr[h] = alpha * acc_scr[h] + jnp.einsum(
            'bqk,bkd->bqd', p.astype(jnp.bfloat16), vh,
            preferred_element_type=jnp.float32)
        m_scr[h] = m_new
        # TODO(synk): dropout(p=0.1) on the attention weights is identity in eval mode.

    @pl.when(kv == n_kv - 1)
    def _finalize():
        out = jnp.zeros((Bt * Nq, Ldp), jnp.float32)
        for h in range(H):
            o_h = acc_scr[h] * pl.reciprocal(l_scr[h], approx=True)   # (Bt, Nq, hdp)
            o2 = o_h.reshape(Bt * Nq, hdp).astype(jnp.bfloat16)
            # 128-aligned row slice of wo + accumulate: removes the lane concat while
            # keeping the same MXU pass count as one fused K=inner matmul.
            out = out + jnp.dot(o2, wo_ref[h * hdp:(h + 1) * hdp, :],
                                preferred_element_type=jnp.float32)
        out = out + bo_ref[...]
        out_ref[...] = out.reshape(Bt, Nq, Ldp).astype(out_ref.dtype)   # lane-dense store


# ------------------------------------------------------------------- one-time weights
def fuse_params(params, *, num_heads, head_dim, lane=_LANE):
    """One-time weight re-layout + padding (hoisted out of the per-call path).

    torch nn.Linear stores weight as (out, in); y = x @ W.T + b.
      * per-head columns padded from head_dim to head_dim_p (128-multiple),
      * contraction dims (latent_dim / data_dim) zero-padded to 128-multiples,
      * to_out output columns padded to latent_dim_p (sliced off by the wrapper),
      * 1/sqrt(head_dim) folded into wq / bq,
      * matmul weights cast to bf16 (f32 accumulation in-kernel); biases stay f32.
    All padding is exact: padded weight rows/cols are zero.
    """
    H, hd = num_heads, head_dim
    Ld = params["w_q"]["weight"].shape[1]
    Dd = params["w_k"]["weight"].shape[1]
    hd_p = _round_up(hd, lane)
    Ld_p = _round_up(Ld, lane)
    Dd_p = _round_up(Dd, lane)
    scale = hd ** (-0.5)

    def in_proj(p, in_dim_p, scl):
        w = p["weight"].reshape(H, hd, -1)                                 # (H, hd, in)
        w = jnp.pad(w, ((0, 0), (0, hd_p - hd), (0, in_dim_p - w.shape[-1])))
        w = (scl * w).reshape(H * hd_p, in_dim_p).T                        # (in_p, H*hd_p)
        b = jnp.pad(p["bias"].reshape(H, hd), ((0, 0), (0, hd_p - hd)))
        b = (scl * b).reshape(1, H * hd_p)
        return w.astype(jnp.bfloat16), b.astype(jnp.float32)

    wq, bq = in_proj(params["w_q"], Ld_p, scale)    # scale folded into Q projection
    wk, bk = in_proj(params["w_k"], Dd_p, 1.0)
    wv, bv = in_proj(params["w_v"], Dd_p, 1.0)

    wo = params["to_out"]["weight"].T.reshape(H, hd, -1)                   # (H, hd, Ld)
    wo = jnp.pad(wo, ((0, 0), (0, hd_p - hd), (0, Ld_p - Ld)))
    wo = wo.reshape(H * hd_p, Ld_p).astype(jnp.bfloat16)                   # (inner_p, Ld_p)
    bo = jnp.pad(params["to_out"]["bias"], (0, Ld_p - Ld)).reshape(1, Ld_p)
    bo = bo.astype(jnp.float32)

    return {"wq": wq, "bq": bq, "wk": wk, "bk": bk, "wv": wv, "bv": bv,
            "wo": wo, "bo": bo,
            "num_heads": H, "head_dim_p": hd_p,
            "latent_dim": Ld, "latent_dim_p": Ld_p,
            "data_dim": Dd, "data_dim_p": Dd_p}


# ----------------------------------------------------------------- tiling heuristics
def _vmem_capacity_bytes():
    try:
        return int(pltpu.get_tpu_info().vmem_capacity_bytes)
    except Exception:
        return 64 * 1024 * 1024          # conservative fallback (v7x per-TC VMEM)


def _num_tensorcores():
    # Only v7x-class chips have 2 TensorCores a 'parallel' grid axis can use;
    # on single-TC v5e/v6e extra grid steps are pure per-step overhead.
    try:
        kind = getattr(jax.devices()[0], "device_kind", "").lower()
        return 2 if "v7" in kind else 1
    except Exception:
        return 1


def _pick_block_k(Nk, max_block=512):
    """KV tile: full Nk when small, else the largest 8-multiple divisor <= max_block."""
    if Nk <= max_block:
        return Nk
    for t in range(max_block, 7, -1):
        if Nk % t == 0 and t % 8 == 0:
            return t
    return Nk   # TODO(synk): ragged Nk would need a masked final KV tile.


def _estimate_vmem_bytes(Bt, *, Nq, Tk, Ld_p, Dd_p, inner_p, hd_p, H):
    f32, bf16 = 4, 2
    blocks = 2 * Bt * (Nq * Ld_p + Tk * Dd_p + Nq * Ld_p) * f32        # 2x-buffered I/O
    weights = 2 * ((Ld_p + 2 * Dd_p) * inner_p + inner_p * Ld_p) * bf16  # 2x-buffered
    scratch = Bt * Nq * inner_p * bf16 + H * Bt * Nq * (hd_p + 2) * f32
    live = Bt * Tk * inner_p * 2 * bf16 + Bt * Nq * (2 * Tk + inner_p) * f32
    return int(1.25 * (blocks + weights + scratch + live))


def _pick_block_b(B, *, min_steps, budget_bytes, est):
    divisors = [d for d in range(1, B + 1) if B % d == 0]
    for want_steps in (min_steps, 1):   # relax the parallel-steps ask if it cannot fit
        fits = [d for d in divisors if B // d >= want_steps and est(d) <= budget_bytes]
        if fits:
            return max(fits)
    return 1


# -------------------------------------------------------------------------- wrapper
def multihead_attention(latent, data, fused, *, block_b=None, block_k=None):
    B, Nq, Ld = latent.shape
    _, Nk, Dd = data.shape
    assert Ld == fused["latent_dim"] and Dd == fused["data_dim"]
    H = fused["num_heads"]
    hd_p = fused["head_dim_p"]
    Ld_p = fused["latent_dim_p"]
    Dd_p = fused["data_dim_p"]
    inner_p = H * hd_p

    # Zero-pad feature dims to the lane boundary (exact: padded weight rows are zero).
    if Ld_p != Ld:
        latent = jnp.pad(latent, ((0, 0), (0, 0), (0, Ld_p - Ld)))
    if Dd_p != Dd:
        data = jnp.pad(data, ((0, 0), (0, 0), (0, Dd_p - Dd)))

    Tk = _pick_block_k(Nk) if block_k is None else block_k
    assert Nk % Tk == 0, "Nk must be divisible by the KV block"

    vmem_cap = _vmem_capacity_bytes()
    vmem_limit = min(vmem_cap * 3 // 4, 100 * 1024 * 1024)
    est = functools.partial(_estimate_vmem_bytes, Nq=Nq, Tk=Tk, Ld_p=Ld_p,
                            Dd_p=Dd_p, inner_p=inner_p, hd_p=hd_p, H=H)
    Bt = (_pick_block_b(B, min_steps=_num_tensorcores(),
                        budget_bytes=vmem_limit - (4 << 20), est=est)
          if block_b is None else block_b)
    assert B % Bt == 0, "batch must be divisible by the batch block"

    kernel = functools.partial(_mha_flash_kernel, num_heads=H, head_dim_p=hd_p)

    out_p = pl.pallas_call(
        kernel,
        out_shape=jax.ShapeDtypeStruct((B, Nq, Ld_p), jnp.float32),
        grid_spec=pltpu.PrefetchScalarGridSpec(
            num_scalar_prefetch=0,
            grid=(B // Bt, Nk // Tk),                                   # KV axis last
            in_specs=[
                pl.BlockSpec((Bt, Nq, Ld_p), lambda b, k: (b, 0, 0)),   # latent
                pl.BlockSpec((Bt, Tk, Dd_p), lambda b, k: (b, k, 0)),   # data (KV tile)
                # Weights / biases: constant index maps (resident across the grid).
                # TODO(synk): pipeline_mode=pl.Buffered(1) here would halve their VMEM
                #             residency once available in the deployed JAX version.
                pl.BlockSpec((Ld_p, inner_p), lambda b, k: (0, 0)),     # wq (scaled)
                pl.BlockSpec((1, inner_p), lambda b, k: (0, 0)),        # bq (scaled)
                pl.BlockSpec((Dd_p, inner_p), lambda b, k: (0, 0)),     # wk
                pl.BlockSpec((1, inner_p), lambda b, k: (0, 0)),        # bk
                pl.BlockSpec((Dd_p, inner_p), lambda b, k: (0, 0)),     # wv
                pl.BlockSpec((1, inner_p), lambda b, k: (0, 0)),        # bv
                pl.BlockSpec((inner_p, Ld_p), lambda b, k: (0, 0)),     # wo
                pl.BlockSpec((1, Ld_p), lambda b, k: (0, 0)),           # bo
            ],
            out_specs=pl.BlockSpec((Bt, Nq, Ld_p), lambda b, k: (b, 0, 0)),
            scratch_shapes=[
                pltpu.VMEM((Bt, Nq, inner_p), jnp.bfloat16),   # cached Q projection
                pltpu.VMEM((H, Bt, Nq, 1), jnp.float32),       # online-softmax m
                pltpu.VMEM((H, Bt, Nq, 1), jnp.float32),       # online-softmax l
                pltpu.VMEM((H, Bt, Nq, hd_p), jnp.float32),    # online-softmax acc
            ],
        ),
        compiler_params=pltpu.CompilerParams(
            dimension_semantics=("parallel", "arbitrary"),
            vmem_limit_bytes=vmem_limit),
    )(latent, data, fused["wq"], fused["bq"], fused["wk"], fused["bk"],
      fused["wv"], fused["bv"], fused["wo"], fused["bo"])

    return out_p[:, :, :Ld]   # drop lane padding outside the kernel (free XLA slice)


# ------------------------------------------------------------------------- reference
def _reference(latent, data, params, *, num_heads, head_dim):
    """Plain-JAX f32 reference mirroring the PyTorch forward (eval mode, mask=None)."""
    B, Nq, Ld = latent.shape
    scale = head_dim ** (-0.5)
    lin = lambda x, p: x @ p["weight"].T + p["bias"]
    Q, K, V = lin(latent, params["w_q"]), lin(data, params["w_k"]), lin(data, params["w_v"])
    split = lambda t: t.reshape(t.shape[0], t.shape[1], num_heads, head_dim).transpose(0, 2, 1, 3)
    Qh, Kh, Vh = split(Q), split(K), split(V)                      # (B, H, n, hd)
    QK = jnp.einsum("bhik,bhjk->bhij", Qh, Kh) * scale
    att = jax.nn.softmax(QK, axis=-1)
    out = jnp.einsum("bhij,bhjd->bhid", att, Vh)                   # (B, H, Nq, hd)
    out = out.transpose(0, 2, 1, 3).reshape(B, Nq, num_heads * head_dim)
    return lin(out, params["to_out"])


def init_params(key, latent_dim, data_dim, num_heads, head_dim):
    inner = num_heads * head_dim
    ks = jax.random.split(key, 8)

    def linear(kw, kb, in_dim, out_dim):
        bound = 1.0 / jnp.sqrt(in_dim)
        return {
            "weight": jax.random.uniform(kw, (out_dim, in_dim), jnp.float32, -bound, bound),
            "bias": jax.random.uniform(kb, (out_dim,), jnp.float32, -bound, bound),
        }

    return {
        "w_q": linear(ks[0], ks[1], latent_dim, inner),
        "w_k": linear(ks[2], ks[3], data_dim, inner),
        "w_v": linear(ks[4], ks[5], data_dim, inner),
        "to_out": linear(ks[6], ks[7], inner, latent_dim),
    }


if __name__ == "__main__":
    B, Nq, Nk = 2, 8, 16
    latent_dim, data_dim = 32, 24
    num_heads, head_dim = 2, 16

    key = jax.random.PRNGKey(0)
    k1, k2, k3 = jax.random.split(key, 3)
    latent = jax.random.normal(k1, (B, Nq, latent_dim), jnp.float32)
    data = jax.random.normal(k2, (B, Nk, data_dim), jnp.float32)
    params = init_params(k3, latent_dim, data_dim, num_heads, head_dim)

    fused = fuse_params(params, num_heads=num_heads, head_dim=head_dim)  # once, off hot path

    # block_k=8 -> two KV grid steps, exercising the online-softmax (flash) path.
    out_flash = jax.block_until_ready(
        multihead_attention(latent, data, fused, block_k=8))
    # Default tiling (single KV step for this small Nk).
    out_default = jax.block_until_ready(
        multihead_attention(latent, data, fused))

    ref = _reference(latent, data, params, num_heads=num_heads, head_dim=head_dim)
    for got in (out_flash, out_default):
        assert got.shape == (B, Nq, latent_dim)
        # Tolerance accommodates bf16 MXU operands (f32 accumulate) and the EUP
        # approx reciprocal in the softmax denominator.
        err = jnp.max(jnp.abs(got - ref))
        assert jnp.allclose(got, ref, atol=3e-2, rtol=3e-2), (
            f"mismatch vs reference (max abs err {err})")

    print("KERNEL_OK")
</pallas_src>

<mosaic_0001>
module attributes {stable_mosaic.version = 11 : i64} {
  func.func @_mha_flash_kernel(%arg0: i32, %arg1: i32, %arg2: memref<2x8x128xf32, #tpu.memory_space<vmem>>, %arg3: memref<2x8x128xf32, #tpu.memory_space<vmem>>, %arg4: memref<128x256xbf16, #tpu.memory_space<vmem>>, %arg5: memref<1x256xf32, #tpu.memory_space<vmem>>, %arg6: memref<128x256xbf16, #tpu.memory_space<vmem>>, %arg7: memref<1x256xf32, #tpu.memory_space<vmem>>, %arg8: memref<128x256xbf16, #tpu.memory_space<vmem>>, %arg9: memref<1x256xf32, #tpu.memory_space<vmem>>, %arg10: memref<256x128xbf16, #tpu.memory_space<vmem>>, %arg11: memref<1x128xf32, #tpu.memory_space<vmem>>, %arg12: memref<2x8x128xf32, #tpu.memory_space<vmem>>, %arg13: memref<2x8x256xbf16, #tpu.memory_space<vmem>>, %arg14: memref<2x2x8x1xf32, #tpu.memory_space<vmem>>, %arg15: memref<2x2x8x1xf32, #tpu.memory_space<vmem>>, %arg16: memref<2x2x8x128xf32, #tpu.memory_space<vmem>>) attributes {dimension_semantics = [#tpu.dimension_semantics<parallel>, #tpu.dimension_semantics<arbitrary>], iteration_bounds = array<i64: 1, 2>, scalar_prefetch = 0 : i64, scratch_operands = 4 : i64, tpu.core_type = #tpu.core_type<tc>, window_params = [{transform_indices = @transform_0, window_bounds = array<i64: 2, 8, 128>}, {transform_indices = @transform_1, window_bounds = array<i64: 2, 8, 128>}, {pipeline_mode = #tpu.pipeline_mode<synchronous>, transform_indices = @transform_2, window_bounds = array<i64: 128, 256>}, {pipeline_mode = #tpu.pipeline_mode<synchronous>, transform_indices = @transform_3, window_bounds = array<i64: 1, 256>}, {pipeline_mode = #tpu.pipeline_mode<synchronous>, transform_indices = @transform_4, window_bounds = array<i64: 128, 256>}, {pipeline_mode = #tpu.pipeline_mode<synchronous>, transform_indices = @transform_5, window_bounds = array<i64: 1, 256>}, {pipeline_mode = #tpu.pipeline_mode<synchronous>, transform_indices = @transform_6, window_bounds = array<i64: 128, 256>}, {pipeline_mode = #tpu.pipeline_mode<synchronous>, transform_indices = @transform_7, window_bounds = array<i64: 1, 256>}, {pipeline_mode = #tpu.pipeline_mode<synchronous>, transform_indices = @transform_8, window_bounds = array<i64: 256, 128>}, {pipeline_mode = #tpu.pipeline_mode<synchronous>, transform_indices = @transform_9, window_bounds = array<i64: 1, 128>}, {transform_indices = @transform_10, window_bounds = array<i64: 2, 8, 128>}]} {
    %c0_i32 = arith.constant 0 : i32
    %0 = arith.cmpi eq, %arg1, %c0_i32 : i32
    %1 = arith.extui %0 : i1 to i32
    %c0_i32_0 = arith.constant 0 : i32
    %2 = arith.cmpi ne, %1, %c0_i32_0 : i32
    scf.if %2 {
      %c0_73 = arith.constant 0 : index
      %c0_74 = arith.constant 0 : index
      %c0_75 = arith.constant 0 : index
      %95 = vector.load %arg2[%c0_73, %c0_74, %c0_75] : memref<2x8x128xf32, #tpu.memory_space<vmem>>, vector<2x8x128xf32>
      %96 = vector.shape_cast %95 : vector<2x8x128xf32> to vector<16x128xf32>
      %97 = arith.truncf %96 : vector<16x128xf32> to vector<16x128xbf16>
      %c0_76 = arith.constant 0 : index
      %c0_77 = arith.constant 0 : index
      %98 = vector.load %arg4[%c0_76, %c0_77] : memref<128x256xbf16, #tpu.memory_space<vmem>>, vector<128x256xbf16>
      %cst_78 = arith.constant dense<0.000000e+00> : vector<16x256xf32>
      %99 = tpu.matmul %97, %98, %cst_78 {dimension_numbers = #tpu.dot_dimension_numbers<[1], [0], [0], [1], [0, 0, 1, 1], [], []>} : vector<16x128xbf16>, vector<128x256xbf16>, vector<16x256xf32> -> vector<16x256xf32>
      %c0_79 = arith.constant 0 : index
      %c0_80 = arith.constant 0 : index
      %100 = vector.load %arg5[%c0_79, %c0_80] : memref<1x256xf32, #tpu.memory_space<vmem>>, vector<1x256xf32>
      %101 = vector.broadcast %100 : vector<1x256xf32> to vector<16x256xf32>
      %102 = arith.addf %99, %101 : vector<16x256xf32>
      %103 = vector.shape_cast %102 : vector<16x256xf32> to vector<2x8x256xf32>
      %104 = arith.truncf %103 : vector<2x8x256xf32> to vector<2x8x256xbf16>
      %c0_81 = arith.constant 0 : index
      %c0_82 = arith.constant 0 : index
      %c0_83 = arith.constant 0 : index
      %105 = vector.load %arg13[%c0_81, %c0_82, %c0_83] : memref<2x8x256xbf16, #tpu.memory_space<vmem>>, vector<2x8x256xbf16>
      tpu.vector_store %arg13[%c0_81, %c0_82, %c0_83], %104 {strides = array<i32>} : memref<2x8x256xbf16, #tpu.memory_space<vmem>>, vector<2x8x256xbf16>,
      %cst_84 = arith.constant 0xFF800000 : f32
      %106 = vector.broadcast %cst_84 : f32 to vector<2x2x8x1xf32>
      %c0_85 = arith.constant 0 : index
      %c0_86 = arith.constant 0 : index
      %c0_87 = arith.constant 0 : index
      %c0_88 = arith.constant 0 : index
      %107 = vector.load %arg14[%c0_85, %c0_86, %c0_87, %c0_88] : memref<2x2x8x1xf32, #tpu.memory_space<vmem>>, vector<2x2x8x1xf32>
      tpu.vector_store %arg14[%c0_85, %c0_86, %c0_87, %c0_88], %106 {strides = array<i32>} : memref<2x2x8x1xf32, #tpu.memory_space<vmem>>, vector<2x2x8x1xf32>,
      %cst_89 = arith.constant 0.000000e+00 : f32
      %108 = vector.broadcast %cst_89 : f32 to vector<2x2x8x1xf32>
      %c0_90 = arith.constant 0 : index
      %c0_91 = arith.constant 0 : index
      %c0_92 = arith.constant 0 : index
      %c0_93 = arith.constant 0 : index
      %109 = vector.load %arg15[%c0_90, %c0_91, %c0_92, %c0_93] : memref<2x2x8x1xf32, #tpu.memory_space<vmem>>, vector<2x2x8x1xf32>
      tpu.vector_store %arg15[%c0_90, %c0_91, %c0_92, %c0_93], %108 {strides = array<i32>} : memref<2x2x8x1xf32, #tpu.memory_space<vmem>>, vector<2x2x8x1xf32>,
      %cst_94 = arith.constant 0.000000e+00 : f32
      %110 = vector.broadcast %cst_94 : f32 to vector<2x2x8x128xf32>
      %c0_95 = arith.constant 0 : index
      %c0_96 = arith.constant 0 : index
      %c0_97 = arith.constant 0 : index
      %c0_98 = arith.constant 0 : index
      %111 = vector.load %arg16[%c0_95, %c0_96, %c0_97, %c0_98] : memref<2x2x8x128xf32, #tpu.memory_space<vmem>>, vector<2x2x8x128xf32>
      tpu.vector_store %arg16[%c0_95, %c0_96, %c0_97, %c0_98], %110 {strides = array<i32>} : memref<2x2x8x128xf32, #tpu.memory_space<vmem>>, vector<2x2x8x128xf32>,
    } else {
    }
    %c0 = arith.constant 0 : index
    %c0_1 = arith.constant 0 : index
    %c0_2 = arith.constant 0 : index
    %3 = vector.load %arg3[%c0, %c0_1, %c0_2] : memref<2x8x128xf32, #tpu.memory_space<vmem>>, vector<2x8x128xf32>
    %4 = vector.shape_cast %3 : vector<2x8x128xf32> to vector<16x128xf32>
    %5 = arith.truncf %4 : vector<16x128xf32> to vector<16x128xbf16>
    %c0_3 = arith.constant 0 : index
    %c0_4 = arith.constant 0 : index
    %6 = vector.load %arg6[%c0_3, %c0_4] : memref<128x256xbf16, #tpu.memory_space<vmem>>, vector<128x256xbf16>
    %cst = arith.constant dense<0.000000e+00> : vector<16x256xf32>
    %7 = tpu.matmul %5, %6, %cst {dimension_numbers = #tpu.dot_dimension_numbers<[1], [0], [0], [1], [0, 0, 1, 1], [], []>} : vector<16x128xbf16>, vector<128x256xbf16>, vector<16x256xf32> -> vector<16x256xf32>
    %c0_5 = arith.constant 0 : index
    %c0_6 = arith.constant 0 : index
    %8 = vector.load %arg7[%c0_5, %c0_6] : memref<1x256xf32, #tpu.memory_space<vmem>>, vector<1x256xf32>
    %9 = vector.broadcast %8 : vector<1x256xf32> to vector<16x256xf32>
    %10 = arith.addf %7, %9 : vector<16x256xf32>
    %c0_7 = arith.constant 0 : index
    %c0_8 = arith.constant 0 : index
    %11 = vector.load %arg8[%c0_7, %c0_8] : memref<128x256xbf16, #tpu.memory_space<vmem>>, vector<128x256xbf16>
    %cst_9 = arith.constant dense<0.000000e+00> : vector<16x256xf32>
    %12 = tpu.matmul %5, %11, %cst_9 {dimension_numbers = #tpu.dot_dimension_numbers<[1], [0], [0], [1], [0, 0, 1, 1], [], []>} : vector<16x128xbf16>, vector<128x256xbf16>, vector<16x256xf32> -> vector<16x256xf32>
    %c0_10 = arith.constant 0 : index
    %c0_11 = arith.constant 0 : index
    %13 = vector.load %arg9[%c0_10, %c0_11] : memref<1x256xf32, #tpu.memory_space<vmem>>, vector<1x256xf32>
    %14 = vector.broadcast %13 : vector<1x256xf32> to vector<16x256xf32>
    %15 = arith.addf %12, %14 : vector<16x256xf32>
    %16 = vector.shape_cast %10 : vector<16x256xf32> to vector<2x8x256xf32>
    %17 = arith.truncf %16 : vector<2x8x256xf32> to vector<2x8x256xbf16>
    %18 = vector.shape_cast %15 : vector<16x256xf32> to vector<2x8x256xf32>
    %19 = arith.truncf %18 : vector<2x8x256xf32> to vector<2x8x256xbf16>
    %c0_12 = arith.constant 0 : index
    %c0_13 = arith.constant 0 : index
    %c0_14 = arith.constant 0 : index
    %20 = vector.load %arg13[%c0_12, %c0_13, %c0_14] : memref<2x8x256xbf16, #tpu.memory_space<vmem>>, vector<2x8x128xbf16>
    %21 = vector.extract_strided_slice %17 {offsets = [0, 0, 0], sizes = [2, 8, 128], strides = [1, 1, 1]} : vector<2x8x256xbf16> to vector<2x8x128xbf16>
    %22 = vector.extract_strided_slice %19 {offsets = [0, 0, 0], sizes = [2, 8, 128], strides = [1, 1, 1]} : vector<2x8x256xbf16> to vector<2x8x128xbf16>
    "tpu.trace_start"() <{level = 10 : i32, message = "bqd,bkd->bqk"}> : () -> ()
    %cst_15 = arith.constant dense<0.000000e+00> : vector<2x8x8xf32>
    %23 = tpu.matmul %20, %21, %cst_15 {dimension_numbers = #tpu.dot_dimension_numbers<[2], [2], [1], [1], [0, 0, 0, 1, 1, 1], [0], [0]>} : vector<2x8x128xbf16>, vector<2x8x128xbf16>, vector<2x8x8xf32> -> vector<2x8x8xf32>
    "tpu.trace_stop"() : () -> ()
    %c0_16 = arith.constant 0 : index
    %c0_17 = arith.constant 0 : index
    %c0_18 = arith.constant 0 : index
    %c0_19 = arith.constant 0 : index
    %24 = vector.load %arg14[%c0_16, %c0_17, %c0_18, %c0_19] : memref<2x2x8x1xf32, #tpu.memory_space<vmem>>, vector<1x2x8x1xf32>
    %25 = vector.shape_cast %24 : vector<1x2x8x1xf32> to vector<2x8x1xf32>
    %cst_20 = arith.constant dense<0xFF800000> : vector<2x8xf32>
    %26 = vector.multi_reduction <maximumf>, %23, %cst_20 [2] : vector<2x8x8xf32> to vector<2x8xf32>
    %27 = vector.shape_cast %26 : vector<2x8xf32> to vector<2x8x1xf32>
    %28 = arith.maximumf %25, %27 : vector<2x8x1xf32>
    %29 = arith.subf %25, %28 : vector<2x8x1xf32>
    %30 = math.exp %29 : vector<2x8x1xf32>
    %31 = vector.broadcast %28 : vector<2x8x1xf32> to vector<2x8x8xf32>
    %32 = arith.subf %23, %31 : vector<2x8x8xf32>
    %33 = math.exp %32 : vector<2x8x8xf32>
    %c0_21 = arith.constant 0 : index
    %c0_22 = arith.constant 0 : index
    %c0_23 = arith.constant 0 : index
    %c0_24 = arith.constant 0 : index
    %34 = vector.load %arg15[%c0_21, %c0_22, %c0_23, %c0_24] : memref<2x2x8x1xf32, #tpu.memory_space<vmem>>, vector<1x2x8x1xf32>
    %35 = vector.shape_cast %34 : vector<1x2x8x1xf32> to vector<2x8x1xf32>
    %36 = arith.mulf %30, %35 : vector<2x8x1xf32>
    %cst_25 = arith.constant dense<0.000000e+00> : vector<2x8xf32>
    %37 = vector.multi_reduction <add>, %33, %cst_25 [2] : vector<2x8x8xf32> to vector<2x8xf32>
    %38 = vector.shape_cast %37 : vector<2x8xf32> to vector<2x8x1xf32>
    %39 = arith.addf %36, %38 : vector<2x8x1xf32>
    %c0_26 = arith.constant 0 : index
    %c0_27 = arith.constant 0 : index
    %c0_28 = arith.constant 0 : index
    %c0_29 = arith.constant 0 : index
    %40 = vector.load %arg15[%c0_26, %c0_27, %c0_28, %c0_29] : memref<2x2x8x1xf32, #tpu.memory_space<vmem>>, vector<1x2x8x1xf32>
    %41 = vector.shape_cast %40 : vector<1x2x8x1xf32> to vector<2x8x1xf32>
    %42 = vector.shape_cast %39 : vector<2x8x1xf32> to vector<1x2x8x1xf32>
    tpu.vector_store %arg15[%c0_26, %c0_27, %c0_28, %c0_29], %42 {strides = array<i32>} : memref<2x2x8x1xf32, #tpu.memory_space<vmem>>, vector<1x2x8x1xf32>,
    %c0_30 = arith.constant 0 : index
    %c0_31 = arith.constant 0 : index
    %c0_32 = arith.constant 0 : index
    %c0_33 = arith.constant 0 : index
    %43 = vector.load %arg16[%c0_30, %c0_31, %c0_32, %c0_33] : memref<2x2x8x128xf32, #tpu.memory_space<vmem>>, vector<1x2x8x128xf32>
    %44 = vector.shape_cast %43 : vector<1x2x8x128xf32> to vector<2x8x128xf32>
    %45 = vector.broadcast %30 : vector<2x8x1xf32> to vector<2x8x128xf32>
    %46 = arith.mulf %45, %44 : vector<2x8x128xf32>
    %47 = arith.truncf %33 : vector<2x8x8xf32> to vector<2x8x8xbf16>
    "tpu.trace_start"() <{level = 10 : i32, message = "bqk,bkd->bqd"}> : () -> ()
    %cst_34 = arith.constant dense<0.000000e+00> : vector<2x8x128xf32>
    %48 = tpu.matmul %47, %22, %cst_34 {dimension_numbers = #tpu.dot_dimension_numbers<[2], [1], [1], [2], [0, 0, 0, 1, 1, 2], [0], [0]>} : vector<2x8x8xbf16>, vector<2x8x128xbf16>, vector<2x8x128xf32> -> vector<2x8x128xf32>
    "tpu.trace_stop"() : () -> ()
    %49 = arith.addf %46, %48 : vector<2x8x128xf32>
    %c0_35 = arith.constant 0 : index
    %c0_36 = arith.constant 0 : index
    %c0_37 = arith.constant 0 : index
    %c0_38 = arith.constant 0 : index
    %50 = vector.load %arg16[%c0_35, %c0_36, %c0_37, %c0_38] : memref<2x2x8x128xf32, #tpu.memory_space<vmem>>, vector<1x2x8x128xf32>
    %51 = vector.shape_cast %50 : vector<1x2x8x128xf32> to vector<2x8x128xf32>
    %52 = vector.shape_cast %49 : vector<2x8x128xf32> to vector<1x2x8x128xf32>
    tpu.vector_store %arg16[%c0_35, %c0_36, %c0_37, %c0_38], %52 {strides = array<i32>} : memref<2x2x8x128xf32, #tpu.memory_space<vmem>>, vector<1x2x8x128xf32>,
    %c0_39 = arith.constant 0 : index
    %c0_40 = arith.constant 0 : index
    %c0_41 = arith.constant 0 : index
    %c0_42 = arith.constant 0 : index
    %53 = vector.load %arg14[%c0_39, %c0_40, %c0_41, %c0_42] : memref<2x2x8x1xf32, #tpu.memory_space<vmem>>, vector<1x2x8x1xf32>
    %54 = vector.shape_cast %53 : vector<1x2x8x1xf32> to vector<2x8x1xf32>
    %55 = vector.shape_cast %28 : vector<2x8x1xf32> to vector<1x2x8x1xf32>
    tpu.vector_store %arg14[%c0_39, %c0_40, %c0_41, %c0_42], %55 {strides = array<i32>} : memref<2x2x8x1xf32, #tpu.memory_space<vmem>>, vector<1x2x8x1xf32>,
    %c0_43 = arith.constant 0 : index
    %c0_44 = arith.constant 0 : index
    %c128 = arith.constant 128 : index
    %56 = vector.load %arg13[%c0_43, %c0_44, %c128] : memref<2x8x256xbf16, #tpu.memory_space<vmem>>, vector<2x8x128xbf16>
    %57 = vector.extract_strided_slice %17 {offsets = [0, 0, 128], sizes = [2, 8, 128], strides = [1, 1, 1]} : vector<2x8x256xbf16> to vector<2x8x128xbf16>
    %58 = vector.extract_strided_slice %19 {offsets = [0, 0, 128], sizes = [2, 8, 128], strides = [1, 1, 1]} : vector<2x8x256xbf16> to vector<2x8x128xbf16>
    "tpu.trace_start"() <{level = 10 : i32, message = "bqd,bkd->bqk"}> : () -> ()
    %cst_45 = arith.constant dense<0.000000e+00> : vector<2x8x8xf32>
    %59 = tpu.matmul %56, %57, %cst_45 {dimension_numbers = #tpu.dot_dimension_numbers<[2], [2], [1], [1], [0, 0, 0, 1, 1, 1], [0], [0]>} : vector<2x8x128xbf16>, vector<2x8x128xbf16>, vector<2x8x8xf32> -> vector<2x8x8xf32>
    "tpu.trace_stop"() : () -> ()
    %c1 = arith.constant 1 : index
    %c0_46 = arith.constant 0 : index
    %c0_47 = arith.constant 0 : index
    %c0_48 = arith.constant 0 : index
    %60 = vector.load %arg14[%c1, %c0_46, %c0_47, %c0_48] : memref<2x2x8x1xf32, #tpu.memory_space<vmem>>, vector<1x2x8x1xf32>
    %61 = vector.shape_cast %60 : vector<1x2x8x1xf32> to vector<2x8x1xf32>
    %cst_49 = arith.constant dense<0xFF800000> : vector<2x8xf32>
    %62 = vector.multi_reduction <maximumf>, %59, %cst_49 [2] : vector<2x8x8xf32> to vector<2x8xf32>
    %63 = vector.shape_cast %62 : vector<2x8xf32> to vector<2x8x1xf32>
    %64 = arith.maximumf %61, %63 : vector<2x8x1xf32>
    %65 = arith.subf %61, %64 : vector<2x8x1xf32>
    %66 = math.exp %65 : vector<2x8x1xf32>
    %67 = vector.broadcast %64 : vector<2x8x1xf32> to vector<2x8x8xf32>
    %68 = arith.subf %59, %67 : vector<2x8x8xf32>
    %69 = math.exp %68 : vector<2x8x8xf32>
    %c1_50 = arith.constant 1 : index
    %c0_51 = arith.constant 0 : index
    %c0_52 = arith.constant 0 : index
    %c0_53 = arith.constant 0 : index
    %70 = vector.load %arg15[%c1_50, %c0_51, %c0_52, %c0_53] : memref<2x2x8x1xf32, #tpu.memory_space<vmem>>, vector<1x2x8x1xf32>
    %71 = vector.shape_cast %70 : vector<1x2x8x1xf32> to vector<2x8x1xf32>
    %72 = arith.mulf %66, %71 : vector<2x8x1xf32>
    %cst_54 = arith.constant dense<0.000000e+00> : vector<2x8xf32>
    %73 = vector.multi_reduction <add>, %69, %cst_54 [2] : vector<2x8x8xf32> to vector<2x8xf32>
    %74 = vector.shape_cast %73 : vector<2x8xf32> to vector<2x8x1xf32>
    %75 = arith.addf %72, %74 : vector<2x8x1xf32>
    %c1_55 = arith.constant 1 : index
    %c0_56 = arith.constant 0 : index
    %c0_57 = arith.constant 0 : index
    %c0_58 = arith.constant 0 : index
    %76 = vector.load %arg15[%c1_55, %c0_56, %c0_57, %c0_58] : memref<2x2x8x1xf32, #tpu.memory_space<vmem>>, vector<1x2x8x1xf32>
    %77 = vector.shape_cast %76 : vector<1x2x8x1xf32> to vector<2x8x1xf32>
    %78 = vector.shape_cast %75 : vector<2x8x1xf32> to vector<1x2x8x1xf32>
    tpu.vector_store %arg15[%c1_55, %c0_56, %c0_57, %c0_58], %78 {strides = array<i32>} : memref<2x2x8x1xf32, #tpu.memory_space<vmem>>, vector<1x2x8x1xf32>,
    %c1_59 = arith.constant 1 : index
    %c0_60 = arith.constant 0 : index
    %c0_61 = arith.constant 0 : index
    %c0_62 = arith.constant 0 : index
    %79 = vector.load %arg16[%c1_59, %c0_60, %c0_61, %c0_62] : memref<2x2x8x128xf32, #tpu.memory_space<vmem>>, vector<1x2x8x128xf32>
    %80 = vector.shape_cast %79 : vector<1x2x8x128xf32> to vector<2x8x128xf32>
    %81 = vector.broadcast %66 : vector<2x8x1xf32> to vector<2x8x128xf32>
    %82 = arith.mulf %81, %80 : vector<2x8x128xf32>
    %83 = arith.truncf %69 : vector<2x8x8xf32> to vector<2x8x8xbf16>
    "tpu.trace_start"() <{level = 10 : i32, message = "bqk,bkd->bqd"}> : () -> ()
    %cst_63 = arith.constant dense<0.000000e+00> : vector<2x8x128xf32>
    %84 = tpu.matmul %83, %58, %cst_63 {dimension_numbers = #tpu.dot_dimension_numbers<[2], [1], [1], [2], [0, 0, 0, 1, 1, 2], [0], [0]>} : vector<2x8x8xbf16>, vector<2x8x128xbf16>, vector<2x8x128xf32> -> vector<2x8x128xf32>
    "tpu.trace_stop"() : () -> ()
    %85 = arith.addf %82, %84 : vector<2x8x128xf32>
    %c1_64 = arith.constant 1 : index
    %c0_65 = arith.constant 0 : index
    %c0_66 = arith.constant 0 : index
    %c0_67 = arith.constant 0 : index
    %86 = vector.load %arg16[%c1_64, %c0_65, %c0_66, %c0_67] : memref<2x2x8x128xf32, #tpu.memory_space<vmem>>, vector<1x2x8x128xf32>
    %87 = vector.shape_cast %86 : vector<1x2x8x128xf32> to vector<2x8x128xf32>
    %88 = vector.shape_cast %85 : vector<2x8x128xf32> to vector<1x2x8x128xf32>
    tpu.vector_store %arg16[%c1_64, %c0_65, %c0_66, %c0_67], %88 {strides = array<i32>} : memref<2x2x8x128xf32, #tpu.memory_space<vmem>>, vector<1x2x8x128xf32>,
    %c1_68 = arith.constant 1 : index
    %c0_69 = arith.constant 0 : index
    %c0_70 = arith.constant 0 : index
    %c0_71 = arith.constant 0 : index
    %89 = vector.load %arg14[%c1_68, %c0_69, %c0_70, %c0_71] : memref<2x2x8x1xf32, #tpu.memory_space<vmem>>, vector<1x2x8x1xf32>
    %90 = vector.shape_cast %89 : vector<1x2x8x1xf32> to vector<2x8x1xf32>
    %91 = vector.shape_cast %64 : vector<2x8x1xf32> to vector<1x2x8x1xf32>
    tpu.vector_store %arg14[%c1_68, %c0_69, %c0_70, %c0_71], %91 {strides = array<i32>} : memref<2x2x8x1xf32, #tpu.memory_space<vmem>>, vector<1x2x8x1xf32>,
    %c1_i32 = arith.constant 1 : i32
    %92 = arith.cmpi eq, %arg1, %c1_i32 : i32
    %93 = arith.extui %92 : i1 to i32
    %c0_i32_72 = arith.constant 0 : i32
    %94 = arith.cmpi ne, %93, %c0_i32_72 : i32
    scf.if %94 {
      %cst_73 = arith.constant 0.000000e+00 : f32
      %95 = vector.broadcast %cst_73 : f32 to vector<16x128xf32>
      %c0_74 = arith.constant 0 : index
      %c0_75 = arith.constant 0 : index
      %c0_76 = arith.constant 0 : index
      %c0_77 = arith.constant 0 : index
      %96 = vector.load %arg16[%c0_74, %c0_75, %c0_76, %c0_77] : memref<2x2x8x128xf32, #tpu.memory_space<vmem>>, vector<1x2x8x128xf32>
      %97 = vector.shape_cast %96 : vector<1x2x8x128xf32> to vector<2x8x128xf32>
      %c0_78 = arith.constant 0 : index
      %c0_79 = arith.constant 0 : index
      %c0_80 = arith.constant 0 : index
      %c0_81 = arith.constant 0 : index
      %98 = vector.load %arg15[%c0_78, %c0_79, %c0_80, %c0_81] : memref<2x2x8x1xf32, #tpu.memory_space<vmem>>, vector<1x2x8x1xf32>
      %99 = vector.shape_cast %98 : vector<1x2x8x1xf32> to vector<2x8x1xf32>
      %100 = tpu.reciprocal %99 {approx = true} : vector<2x8x1xf32> -> vector<2x8x1xf32>
      %101 = vector.broadcast %100 : vector<2x8x1xf32> to vector<2x8x128xf32>
      %102 = arith.mulf %97, %101 : vector<2x8x128xf32>
      %103 = vector.shape_cast %102 : vector<2x8x128xf32> to vector<16x128xf32>
      %104 = arith.truncf %103 : vector<16x128xf32> to vector<16x128xbf16>
      %c0_82 = arith.constant 0 : index
      %c0_83 = arith.constant 0 : index
      %105 = vector.load %arg10[%c0_82, %c0_83] : memref<256x128xbf16, #tpu.memory_space<vmem>>, vector<128x128xbf16>
      %cst_84 = arith.constant dense<0.000000e+00> : vector<16x128xf32>
      %106 = tpu.matmul %104, %105, %cst_84 {dimension_numbers = #tpu.dot_dimension_numbers<[1], [0], [0], [1], [0, 0, 1, 1], [], []>} : vector<16x128xbf16>, vector<128x128xbf16>, vector<16x128xf32> -> vector<16x128xf32>
      %107 = arith.addf %95, %106 : vector<16x128xf32>
      %c1_85 = arith.constant 1 : index
      %c0_86 = arith.constant 0 : index
      %c0_87 = arith.constant 0 : index
      %c0_88 = arith.constant 0 : index
      %108 = vector.load %arg16[%c1_85, %c0_86, %c0_87, %c0_88] : memref<2x2x8x128xf32, #tpu.memory_space<vmem>>, vector<1x2x8x128xf32>
      %109 = vector.shape_cast %108 : vector<1x2x8x128xf32> to vector<2x8x128xf32>
      %c1_89 = arith.constant 1 : index
      %c0_90 = arith.constant 0 : index
      %c0_91 = arith.constant 0 : index
      %c0_92 = arith.constant 0 : index
      %110 = vector.load %arg15[%c1_89, %c0_90, %c0_91, %c0_92] : memref<2x2x8x1xf32, #tpu.memory_space<vmem>>, vector<1x2x8x1xf32>
      %111 = vector.shape_cast %110 : vector<1x2x8x1xf32> to vector<2x8x1xf32>
      %112 = tpu.reciprocal %111 {approx = true} : vector<2x8x1xf32> -> vector<2x8x1xf32>
      %113 = vector.broadcast %112 : vector<2x8x1xf32> to vector<2x8x128xf32>
      %114 = arith.mulf %109, %113 : vector<2x8x128xf32>
      %115 = vector.shape_cast %114 : vector<2x8x128xf32> to vector<16x128xf32>
      %116 = arith.truncf %115 : vector<16x128xf32> to vector<16x128xbf16>
      %c128_93 = arith.constant 128 : index
      %c0_94 = arith.constant 0 : index
      %117 = vector.load %arg10[%c128_93, %c0_94] : memref<256x128xbf16, #tpu.memory_space<vmem>>, vector<128x128xbf16>
      %cst_95 = arith.constant dense<0.000000e+00> : vector<16x128xf32>
      %118 = tpu.matmul %116, %117, %cst_95 {dimension_numbers = #tpu.dot_dimension_numbers<[1], [0], [0], [1], [0, 0, 1, 1], [], []>} : vector<16x128xbf16>, vector<128x128xbf16>, vector<16x128xf32> -> vector<16x128xf32>
      %119 = arith.addf %107, %118 : vector<16x128xf32>
      %c0_96 = arith.constant 0 : index
      %c0_97 = arith.constant 0 : index
      %120 = vector.load %arg11[%c0_96, %c0_97] : memref<1x128xf32, #tpu.memory_space<vmem>>, vector<1x128xf32>
      %121 = vector.broadcast %120 : vector<1x128xf32> to vector<16x128xf32>
      %122 = arith.addf %119, %121 : vector<16x128xf32>
      %123 = vector.shape_cast %122 : vector<16x128xf32> to vector<2x8x128xf32>
      %c0_98 = arith.constant 0 : index
      %c0_99 = arith.constant 0 : index
      %c0_100 = arith.constant 0 : index
      %124 = vector.load %arg12[%c0_98, %c0_99, %c0_100] : memref<2x8x128xf32, #tpu.memory_space<vmem>>, vector<2x8x128xf32>
      tpu.vector_store %arg12[%c0_98, %c0_99, %c0_100], %123 {strides = array<i32>} : memref<2x8x128xf32, #tpu.memory_space<vmem>>, vector<2x8x128xf32>,
    } else {
    }
    return
  }
  func.func @transform_0(%arg0: i32, %arg1: i32) -> (i32, i32, i32) {
    %c0_i32 = arith.constant 0 : i32
    %c0_i32_0 = arith.constant 0 : i32
    %c0_i32_1 = arith.constant 0 : i32
    return %arg0, %c0_i32, %c0_i32_0 : i32, i32, i32
  }
  func.func @transform_1(%arg0: i32, %arg1: i32) -> (i32, i32, i32) {
    %c0_i32 = arith.constant 0 : i32
    %c0_i32_0 = arith.constant 0 : i32
    return %arg0, %arg1, %c0_i32 : i32, i32, i32
  }
  func.func @transform_2(%arg0: i32, %arg1: i32) -> (i32, i32) {
    %c0_i32 = arith.constant 0 : i32
    %c0_i32_0 = arith.constant 0 : i32
    %c0_i32_1 = arith.constant 0 : i32
    return %c0_i32, %c0_i32_0 : i32, i32
  }
  func.func @transform_3(%arg0: i32, %arg1: i32) -> (i32, i32) {
    %c0_i32 = arith.constant 0 : i32
    %c0_i32_0 = arith.constant 0 : i32
    %c0_i32_1 = arith.constant 0 : i32
    return %c0_i32, %c0_i32_0 : i32, i32
  }
  func.func @transform_4(%arg0: i32, %arg1: i32) -> (i32, i32) {
    %c0_i32 = arith.constant 0 : i32
    %c0_i32_0 = arith.constant 0 : i32
    %c0_i32_1 = arith.constant 0 : i32
    return %c0_i32, %c0_i32_0 : i32, i32
  }
  func.func @transform_5(%arg0: i32, %arg1: i32) -> (i32, i32) {
    %c0_i32 = arith.constant 0 : i32
    %c0_i32_0 = arith.constant 0 : i32
    %c0_i32_1 = arith.constant 0 : i32
    return %c0_i32, %c0_i32_0 : i32, i32
  }
  func.func @transform_6(%arg0: i32, %arg1: i32) -> (i32, i32) {
    %c0_i32 = arith.constant 0 : i32
    %c0_i32_0 = arith.constant 0 : i32
    %c0_i32_1 = arith.constant 0 : i32
    return %c0_i32, %c0_i32_0 : i32, i32
  }
  func.func @transform_7(%arg0: i32, %arg1: i32) -> (i32, i32) {
    %c0_i32 = arith.constant 0 : i32
    %c0_i32_0 = arith.constant 0 : i32
    %c0_i32_1 = arith.constant 0 : i32
    return %c0_i32, %c0_i32_0 : i32, i32
  }
  func.func @transform_8(%arg0: i32, %arg1: i32) -> (i32, i32) {
    %c0_i32 = arith.constant 0 : i32
    %c0_i32_0 = arith.constant 0 : i32
    %c0_i32_1 = arith.constant 0 : i32
    return %c0_i32, %c0_i32_0 : i32, i32
  }
  func.func @transform_9(%arg0: i32, %arg1: i32) -> (i32, i32) {
    %c0_i32 = arith.constant 0 : i32
    %c0_i32_0 = arith.constant 0 : i32
    %c0_i32_1 = arith.constant 0 : i32
    return %c0_i32, %c0_i32_0 : i32, i32
  }
  func.func @transform_10(%arg0: i32, %arg1: i32) -> (i32, i32, i32) {
    %c0_i32 = arith.constant 0 : i32
    %c0_i32_0 = arith.constant 0 : i32
    %c0_i32_1 = arith.constant 0 : i32
    return %arg0, %c0_i32, %c0_i32_0 : i32, i32, i32
  }
}

</mosaic_0001>

<bundles_post_ra>
// kernel: tpu_custom_call.1
= control target key start
LH: loop header
LB: loop body
LE: loop exit
PB: predicated region body
PF: predicated region fallthrough
CT: control target
= control target key end

     0   :  { %s3079_s0 = inlined_call_operand.hbm [shape: f32[2,8,128], index: 0, kind: input, shape index: {}]   ;;  %s3080_s1 = inlined_call_operand.hbm [shape: f32[2,16,128], index: 1, kind: input, shape index: {}]   ;;  %s3081_s2 = inlined_call_operand.hbm [shape: bf16[128,256], index: 2, kind: input, shape index: {}]   ;;  %s3082_s3 = inlined_call_operand.vmem [shape: f32[1,256], index: 3, kind: input, shape index: {}]   ;;  %s3083_s4 = inlined_call_operand.hbm [shape: bf16[128,256], index: 4, kind: input, shape index: {}]   ;;  %s3084_s5 = inlined_call_operand.vmem [shape: f32[1,256], index: 5, kind: input, shape index: {}]   ;;  %s3085_s6 = inlined_call_operand.hbm [shape: bf16[128,256], index: 6, kind: input, shape index: {}]   ;;  %s3086_s7 = inlined_call_operand.vmem [shape: f32[1,256], index: 7, kind: input, shape index: {}]   ;;  %s3087_s8 = inlined_call_operand.hbm [shape: bf16[256,128], index: 8, kind: input, shape index: {}]   ;;  %s3088_s9 = inlined_call_operand.vmem [shape: f32[1,128], index: 9, kind: input, shape index: {}]   ;;  %s3089_s10 = inlined_call_operand.hbm [shape: f32[2,8,128], index: 10, kind: output, shape index: {}]  }
   0x1   :  { %3094 = sst [smem:[#allocation24_spill]] %s3081_s2 }
   0x2   :  { %3095 = sst [smem:[#allocation25_spill]] %s3086_s7 }
   0x3   :  { %3096 = sst [smem:[#allocation26_spill]] %s3088_s9 }
   0x4   :  { %3097 = sst [smem:[#allocation27_spill]] %s3089_s10 }
   0x5   :  { %15 = vsyncpa [#allocation7], 0 }
   0x6   :  { %16 = vsyncpa [#allocation10], 0 }
   0x7   :  { %18 = vsyncpa [#allocation10 + $0x1], 0 }
   0x8   :  { %19 = vsyncpa [#allocation13], 0 }
   0x9   :  { %20 = vsyncpa [#allocation16], 0 }
   0xa   :  { %21 = vsyncpa [#allocation8], 0  ;;  %s2663_s13 = smov 0   ;;  %s2665_s14 = smov 0  }
   0xb   :  { %s2667_s15 = smov 0   ;;  %s2669_s16 = smov 0  }
   0xc   :  { %s2671_s17 = smov 0   ;;  %s2673_s18 = smov 0  }
   0xd LB: > { %s2692_s19 = sadd.s32 4294967295, %s2583_s18   ;;  %p87_p0 = scmp.ne.s32.totalorder %s2567_s14, %s2563_s13  ;;  %s2583_s18 = sphi %s2673_s18, %s27_s18   ;;  %s2579_s17 = sphi %s2671_s17, %s3121_s17   ;;  %s2575_s16 = sphi %s2669_s16, %s3120_s16   ;;  %s2571_s15 = sphi %s2667_s15, %s3119_s15   ;;  %s2567_s14 = sphi %s2665_s14, %s3118_s14   ;;  %s2563_s13 = sphi %s2663_s13, %s3117_s13  }
   0xe   : > { %p3090_p1 = scmp.eq.s32.totalorder %s2692_s19, 0  ;;  %p1855_p2 = scmp.ge.s32.totalorder %s2583_s18, 1 }
   0xf   : > { %p292_p3 = scmp.lt.s32.totalorder %s2583_s18, 3  ;;  %s2585_s22 = smov [#allocation11]  }
  0x10   : > { %p2700_p4 = por %p3090_p1, %p87_p0  ;;  %s320_s23 = sshll.u32 %s2585_s22, 4  ;;  %s321_s23 = int_to_ptr.vmem [resolvable:$true] %s320_s23 }
  0x11   : > { %p2704_p5 = pnand %p1855_p2, %p292_p3  ;;  %s2586_s25 = smov [#allocation12]  }
  0x12   : > { %s3098_s20 = scalar_select %p2700_p4, 1, 0 }
  0x13   : > { %s3099_s21 = scalar_select %p2704_p5, 1, 0 }
  0x14   : > { %p2098_p6 = pneg %p2704_p5  ;;  %s336_s26 = sshll.u32 %s2586_s25, 4  ;;  %s2716_s26 = int_to_ptr.vmem [resolvable:$true] %s336_s26 }
  0x15   : > { %s3101_s2 = sld [smem:[#allocation24_spill]] }
  0x16   : > { %p2712_p7 = pnand %p2098_p6, %p3090_p1 }
  0x18   : > { %p2726_p9 = pneg %p2712_p7 }
  0x1b   : > { %s2317_s29 = scalar_lea.hbm %s3101_s2, 2048 }
  0x1c   : > { %p2318_p8 = scmp.ne.s32.totalorder %s3101_s2, %s2317_s29  ;;  %p2324_p12 = scmp.lt.u32.totalorder %s2317_s29, %s3101_s2 }
  0x1e   : > { %p2320_p10 = pnand %p2726_p9, %p2318_p8 }
  0x20   : > { %p2321_p11 = pneg %p2320_p10 }
  0x22   : > { %p2326_p13 = pnand %p2324_p12, %p2321_p11 }
  0x24   : > { %2329 = shalt.err (!%p2326_p13)
}
  0x25   : > { %s2330_s25 = scalar_lea.vmem %s321_s23, 2048  ;;  %p2338_p6 = scmp.lt.s32.totalorder %s321_s23, %s321_s23 }
  0x26   : > { %p2331_p0 = scmp.ne.s32.totalorder %s321_s23, %s2330_s25  ;;  %p2339_p1 = scmp.lt.s32.totalorder %s2330_s25, %s2330_s25 }
  0x28   : > { %p2333_p2 = pnand %p2331_p0, %p2726_p9  ;;  %p2340_p4 = por %p2339_p1, %p2338_p6 }
  0x2a   : > { %p2334_p3 = pneg %p2333_p2 }
  0x2c   : > { %p2341_p5 = pnand %p2340_p4, %p2334_p3 }
  0x2e   : > { %2344 = shalt.err (!%p2341_p5)
}
  0x2f   : > { %s2587_s27 = smov 128   ;;  %s2588_s28 = smov 8  }
  0x30   : > { %2104 = dma.hbm_to_vmem [thread:$0]  (!%p2712_p7), %s3101_s2, 2048, %s321_s23, [#allocation10], %s2587_s27, %s2587_s27, %s2588_s28  }
  0x31   : > { %s2345_s22 = scalar_lea.hbm %s3083_s4, 2048 }
  0x32   : > { %p2346_p1 = scmp.ne.s32.totalorder %s3083_s4, %s2345_s22  ;;  %p2352_p8 = scmp.lt.u32.totalorder %s2345_s22, %s3083_s4 }
  0x34   : > { %p2348_p4 = pnand %p2346_p1, %p2726_p9 }
  0x36   : > { %p2349_p5 = pneg %p2348_p4 }
  0x38   : > { %p2354_p10 = pnand %p2352_p8, %p2349_p5 }
  0x3a   : > { %2357 = shalt.err (!%p2354_p10)
}
  0x3b   : > { %s2358_s23 = scalar_lea.vmem %s2716_s26, 2048  ;;  %p2366_p0 = scmp.lt.s32.totalorder %s2716_s26, %s2716_s26 }
  0x3c   : > { %p2359_p11 = scmp.ne.s32.totalorder %s2716_s26, %s2358_s23  ;;  %p2367_p2 = scmp.lt.s32.totalorder %s2358_s23, %s2358_s23 }
  0x3e   : > { %p2361_p12 = pnand %p2359_p11, %p2726_p9  ;;  %p2368_p3 = por %p2367_p2, %p2366_p0 }
  0x40   : > { %p2362_p13 = pneg %p2361_p12 }
  0x42   : > { %p2369_p6 = pnand %p2368_p3, %p2362_p13 }
  0x44   : > { %2372 = shalt.err (!%p2369_p6)
}
  0x45   : > { %2107 = dma.hbm_to_vmem [thread:$0]  (!%p2712_p7), %s3083_s4, 2048, %s2716_s26, [#allocation13], %s2587_s27, %s2587_s27, %s2588_s28  }
  0x46   : > { %s2589_s10 = smov [#allocation6]   ;;  %s2590_s30 = smov [#allocation14]  }
  0x47   : > { %s307_s29 = sshll.u32 %s2589_s10, 4  ;;  %s352_s11 = sshll.u32 %s2590_s30, 4  ;;  %s308_s29 = int_to_ptr.vmem [resolvable:$true] %s307_s29  ;;  %s2771_s11 = int_to_ptr.vmem [resolvable:$true] %s352_s11 }
  0x48   : > { %s2373_s25 = scalar_lea.hbm %s3079_s0, 256 }
  0x49   : > { %p2374_p1 = scmp.ne.s32.totalorder %s3079_s0, %s2373_s25  ;;  %p2380_p8 = scmp.lt.u32.totalorder %s2373_s25, %s3079_s0 }
  0x4b   : > { %p2376_p4 = pnand %p2374_p1, %p2726_p9 }
  0x4d   : > { %p2377_p5 = pneg %p2376_p4 }
  0x4f   : > { %p2382_p10 = pnand %p2380_p8, %p2377_p5 }
  0x51   : > { %2385 = shalt.err (!%p2382_p10)
}
  0x52   : > { %s2386_s9 = scalar_lea.vmem %s308_s29, 256  ;;  %p2394_p0 = scmp.lt.s32.totalorder %s308_s29, %s308_s29 }
  0x53   : > { %p2387_p11 = scmp.ne.s32.totalorder %s308_s29, %s2386_s9  ;;  %p2395_p2 = scmp.lt.s32.totalorder %s2386_s9, %s2386_s9 }
  0x55   : > { %p2389_p12 = pnand %p2387_p11, %p2726_p9  ;;  %p2396_p3 = por %p2395_p2, %p2394_p0 }
  0x57   : > { %p2390_p13 = pneg %p2389_p12 }
  0x59   : > { %p2397_p6 = pnand %p2396_p3, %p2390_p13 }
  0x5b   : > { %2400 = shalt.err (!%p2397_p6)
}
  0x5c   : > { %2101 = dma.hbm_to_vmem [thread:$0]  (!%p2712_p7), %s3079_s0, 256, %s308_s29, [#allocation7], %s2587_s27, %s2587_s27, %s2588_s28  }
  0x5d   : > { %s2401_s22 = scalar_lea.hbm %s3085_s6, 2048 }
  0x5e   : > { %p2402_p1 = scmp.ne.s32.totalorder %s3085_s6, %s2401_s22  ;;  %p2408_p8 = scmp.lt.u32.totalorder %s2401_s22, %s3085_s6 }
  0x60   : > { %p2404_p4 = pnand %p2402_p1, %p2726_p9 }
  0x62   : > { %p2405_p5 = pneg %p2404_p4 }
  0x64   : > { %p2410_p10 = pnand %p2408_p8, %p2405_p5 }
  0x66   : > { %2413 = shalt.err (!%p2410_p10)
}
  0x67   : > { %s2414_s29 = scalar_lea.vmem %s2771_s11, 2048  ;;  %p2422_p0 = scmp.lt.s32.totalorder %s2771_s11, %s2771_s11 }
  0x68   : > { %p2415_p11 = scmp.ne.s32.totalorder %s2771_s11, %s2414_s29  ;;  %p2423_p2 = scmp.lt.s32.totalorder %s2414_s29, %s2414_s29 }
  0x6a   : > { %p2417_p12 = pnand %p2415_p11, %p2726_p9  ;;  %p2424_p3 = por %p2423_p2, %p2422_p0 }
  0x6c   : > { %p2418_p13 = pneg %p2417_p12 }
  0x6e   : > { %p2425_p6 = pnand %p2424_p3, %p2418_p13 }
  0x70   : > { %2428 = shalt.err (!%p2425_p6)
}
  0x71   : > { %2110 = dma.hbm_to_vmem [thread:$0]  (!%p2712_p7), %s3085_s6, 2048, %s2771_s11, [#allocation13], %s2587_s27, %s2587_s27, %s2588_s28  }
  0x72   : > { %s2591_s10 = smov [#allocation15]   ;;  %s2429_s25 = scalar_lea.hbm %s3087_s8, 2048 }
  0x73   : > { %s368_s30 = sshll.u32 %s2591_s10, 4  ;;  %p2430_p1 = scmp.ne.s32.totalorder %s3087_s8, %s2429_s25  ;;  %s369_s30 = int_to_ptr.vmem [resolvable:$true] %s368_s30 }
  0x74   : > { %p2436_p8 = scmp.lt.u32.totalorder %s2429_s25, %s3087_s8 }
  0x75   : > { %p2432_p4 = pnand %p2430_p1, %p2726_p9 }
  0x77   : > { %p2433_p5 = pneg %p2432_p4 }
  0x79   : > { %p2438_p10 = pnand %p2436_p8, %p2433_p5 }
  0x7b   : > { %2441 = shalt.err (!%p2438_p10)
}
  0x7c   : > { %s2442_s11 = scalar_lea.vmem %s369_s30, 2048  ;;  %p2450_p0 = scmp.lt.s32.totalorder %s369_s30, %s369_s30 }
  0x7d   : > { %p2443_p11 = scmp.ne.s32.totalorder %s369_s30, %s2442_s11  ;;  %p2451_p2 = scmp.lt.s32.totalorder %s2442_s11, %s2442_s11 }
  0x7f   : > { %p2445_p12 = pnand %p2443_p11, %p2726_p9  ;;  %p2452_p3 = por %p2451_p2, %p2450_p0 }
  0x81   : > { %p2446_p13 = pneg %p2445_p12 }
  0x83   : > { %p2453_p6 = pnand %p2452_p3, %p2446_p13 }
  0x85   : > { %2456 = shalt.err (!%p2453_p6)
}
  0x86   : > { %s2592_s9 = smov 64   ;;  %s2593_s12 = smov 4  }
  0x87   : > { %2113 = dma.hbm_to_vmem [thread:$0]  (!%p2712_p7), %s3087_s8, 2048, %s369_s30, [#allocation16], %s2592_s9, %s2592_s9, %s2593_s12  }
  0x88   : > { %s74_s13 = sadd.s32 1, %s2571_s15  ;;  %s36_s22 = sadd.s32 1, %s2579_s17 }
  0x89   : > { %p81_p9 = scmp.ne.s32.totalorder %s2571_s15, %s2567_s14  ;;  %p37_p1 = scmp.ge.s32.totalorder %s36_s22, 2 }
  0x8a   : > { %p82_p4 = scmp.eq.s32.totalorder %s2583_s18, 0  ;;  %p2123_p5 = scmp.lt.s32.totalorder %s2583_s18, 2 }
  0x8b   : > { %s385_s25 = sand.u32 1, %s2583_s18   ;;  %s3123_s22 = smov (%p37_p1, %s36_s22), 0 }
  0x8c   : > { %p83_p8 = por %p82_p4, %p81_p9  ;;  %s70_s23 = ssub.s32 %s2579_s17, %s3123_s22 }
  0x8d   : > { %s387_s7 = sand.u32 1, %s2571_s15   ;;  %p72_p10 = scmp.eq.s32.totalorder %s70_s23, 0 }
  0x8e   : > { %s1862_s24 = sshll.u32 %s387_s7, 4  ;;  %s1863_s26 = sshll.u32 %s2579_s17, 7 }
  0x8f   : > { %s2852_s29 = scalar_select %p72_p10, %s2571_s15, %s74_s13  }
  0x90   : > { %s2857_s9 = scalar_lea.hbm %s3080_s1, %s1863_s26  ;;  %s389_s12 = scalar_lea.vmem [#allocation9], %s1862_s24 }
  0x91   : > { %s398_s2 = sshll.u32 %s389_s12, 4  ;;  %p2863_p7 = pnand %p2123_p5, %p83_p8  ;;  %s2859_s2 = int_to_ptr.vmem [resolvable:$true] %s398_s2 }
  0x92   : > { %s2867_s13 = scalar_lea.sflag [#allocation10], %s385_s25  ;;  %s2457_s23 = scalar_lea.hbm %s2857_s9, 256 }
  0x93   : > { %p2458_p11 = scmp.ne.s32.totalorder %s2857_s9, %s2457_s23  ;;  %p2459_p12 = pneg %p2863_p7 }
  0x94   : > { %s2462_s26 = scalar_lea.hbm %s3080_s1, 512  ;;  %p2463_p2 = scmp.lt.u32.totalorder %s2857_s9, %s3080_s1 }
  0x95   : > { %p2460_p13 = pnand %p2459_p12, %p2458_p11  ;;  %p2464_p3 = scmp.lt.u32.totalorder %s2462_s26, %s2457_s23 }
  0x96   : > { %p2466_p9 = scmp.lt.u32.totalorder %s2457_s23, %s2857_s9 }
  0x97   : > { %p2461_p0 = pneg %p2460_p13  ;;  %p2465_p6 = por %p2464_p3, %p2463_p2 }
  0x99   : > { %p2467_p1 = por %p2466_p9, %p2465_p6 }
  0x9b   : > { %p2468_p4 = pnand %p2467_p1, %p2461_p0 }
  0x9d   : > { %2471 = shalt.err (!%p2468_p4)
}
  0x9e   : > { %s2472_s25 = scalar_lea.vmem %s2859_s2, 256  ;;  %s2594_s12 = smov [#allocation9]  }
  0x9f   : > { %p2473_p5 = scmp.ne.s32.totalorder %s2859_s2, %s2472_s25  ;;  %s2477_s7 = sshll.u32 %s2594_s12, 4  ;;  %s2478_s7 = int_to_ptr.vmem [resolvable:$false] %s2477_s7 }
  0xa0   : > { %s2479_s24 = scalar_lea.vmem %s2478_s7, 512  ;;  %p2480_p11 = scmp.lt.s32.totalorder %s2859_s2, %s2478_s7 }
  0xa1   : > { %p2475_p8 = pnand %p2473_p5, %p2459_p12  ;;  %p2481_p13 = scmp.lt.s32.totalorder %s2479_s24, %s2472_s25 }
  0xa3   : > { %p2476_p10 = pneg %p2475_p8  ;;  %p2482_p2 = por %p2481_p13, %p2480_p11 }
  0xa5   : > { %p2483_p3 = pnand %p2482_p2, %p2476_p10 }
  0xa7   : > { %2486 = shalt.err (!%p2483_p3)
}
  0xa8   : > { %s2595_s23 = smov 256   ;;  %p3104_p12 = scmp.ne.s32.totalorder %s3099_s21, 0 }
  0xa9   : > { %2117 = dma.hbm_to_vmem [thread:$0]  (!%p2863_p7), %s2857_s9, 256, %s2859_s2, %s2867_s13, %s2595_s23, %s2587_s27, %s2588_s28  }
  0xaa   : > { %410 = sbr.rel (%p3104_p12) target bundleno = 2265 (0x8d9), region = 60  ;;  %p3105_p0 = scmp.eq.s32.totalorder (!%p3104_p12), %s2692_s19, 0 }
  0xb1   : > { %2538 = dma.done.wait (%p3105_p0), [#allocation7], 256   ;;  %p3106_p6 = pmov %p3105_p0 }
  0xb2   : > { %s416_s26 = sand.u32 1, %s2692_s19   ;;  %s418_s10 = sand.u32 1, %s2567_s14  }
  0xb3   : > { %2540 = vsyncadd (%p3106_p6), [#allocation7], 4294967040  ;;  %s2905_s30 = sshll.u32 %s418_s10, 4  ;;  %s417_s11 = scalar_lea.sflag [#allocation10], %s416_s26 }
  0xb4   : > { %s420_s25 = scalar_lea.vmem [#allocation9], %s2905_s30  ;;  %p3107_p7 = scmp.ne.s32.totalorder %s3098_s20, 0 }
  0xb6   : > { %2542 = dma.done.wait (%p3107_p7), %s417_s11, 256  }
  0xb7   : > { %2544 = vsyncadd (%p3107_p7), %s417_s11, 4294967040  ;;  %p3108_p9 = pmov %p3105_p0 }
  0xb8   : > { %p3109_p1 = pmov %p3105_p0 }
  0xb9   : > { %2546 = dma.done.wait (%p3108_p9), [#allocation10], 2048  }
  0xba   : > { %2548 = vsyncadd (%p3109_p1), [#allocation10], 4294965248  ;;  %p3110_p4 = pmov %p3105_p0 }
  0xbb   : > { %p3111_p5 = pmov %p3105_p0 }
  0xbc   : > { %2550 = dma.done.wait (%p3110_p4), [#allocation13], 4096  }
  0xbd   : > { %2552 = vsyncadd (%p3111_p5), [#allocation13], 4294963200  ;;  %p3112_p8 = pmov %p3105_p0 }
  0xbe   : > { %p3113_p10 = pmov %p3105_p0 }
  0xbf   : > { %2554 = dma.done.wait (%p3112_p8), [#allocation16], 2048  }
  0xc0   : > { %2556 = vsyncadd (%p3113_p10), [#allocation16], 4294965248  ;;  %p1871_p11 = scmp.ne.s32.totalorder %s2575_s16, 0 }
  0xc1   : > { %v2201_v0 = vld [vmem:[#allocation11 + $0x4] ss:$8 sps:$4 sm:$0xff] (!%p1871_p11)   ;;  %v2203_v1 = vld [vmem:[#allocation11] ss:$8 sps:$4 sm:$0xff] (!%p1871_p11)   ;;  %v2596_v2 = vmov (!%p1871_p11), 0   ;;  %v476_v17 = vld [vmem:[#allocation6] sm:$0xff] (!%p1871_p11)  ;;  %v497_v22 = vlaneseq (!%p1871_p11) }
  0xc2   : > { %475 = sbr.rel (%p1871_p11) target bundleno = 446 (0x1be), region = 88  ;;  %619 = vmatprep.mubr.bf16.mxu0 (!%p1871_p11), %v2596_v2  ;;  %587 = vmatprep.subr.bf16.mxu0 (!%p1871_p11), %v2201_v0  ;;  %v2204_v3 = vld [vmem:[#allocation11 + $0x14] ss:$8 sps:$4 sm:$0xff] (!%p1871_p11)   ;;  %v2206_v4 = vld [vmem:[#allocation11 + $0x10] ss:$8 sps:$4 sm:$0xff] (!%p1871_p11)   ;;  %vm648_vm0 = vcmask (!%p1871_p11), 7168  }
  0xc3   : > { %588 = vmatpush1.bf16.msra.mxu0 (!%p1871_p11), %v2203_v1  ;;  %v2207_v5 = vld [vmem:[#allocation11 + $0x24] ss:$8 sps:$4 sm:$0xff] (!%p1871_p11)   ;;  %v2209_v6 = vld [vmem:[#allocation11 + $0x20] ss:$8 sps:$4 sm:$0xff] (!%p1871_p11)   ;;  %v2210_v7 = vld [vmem:[#allocation11 + $0x34] ss:$8 sps:$4 sm:$0xff] (!%p1871_p11)  }
  0xc4   : > { %589 = vmatprep.subr.bf16.mxu0 (!%p1871_p11), %v2204_v3  ;;  %v2212_v8 = vld [vmem:[#allocation11 + $0x30] ss:$8 sps:$4 sm:$0xff] (!%p1871_p11)   ;;  %v2213_v9 = vld [vmem:[#allocation11 + $0x44] ss:$8 sps:$4 sm:$0xff] (!%p1871_p11)   ;;  %v2215_v10 = vld [vmem:[#allocation11 + $0x40] ss:$8 sps:$4 sm:$0xff] (!%p1871_p11)  }
  0xc5   : > { %v2216_v11 = vld [vmem:[#allocation11 + $0x54] ss:$8 sps:$4 sm:$0xff] (!%p1871_p11)   ;;  %v2218_v12 = vld [vmem:[#allocation11 + $0x50] ss:$8 sps:$4 sm:$0xff] (!%p1871_p11)   ;;  %v2219_v13 = vld [vmem:[#allocation11 + $0x64] ss:$8 sps:$4 sm:$0xff] (!%p1871_p11)  }
  0xc6   : > { %v2221_v14 = vld [vmem:[#allocation11 + $0x60] ss:$8 sps:$4 sm:$0xff] (!%p1871_p11)   ;;  %v2222_v15 = vld [vmem:[#allocation11 + $0x74] ss:$8 sps:$4 sm:$0xff] (!%p1871_p11)   ;;  %v2224_v16 = vld [vmem:[#allocation11 + $0x70] ss:$8 sps:$4 sm:$0xff] (!%p1871_p11)  }
  0xc7   : > { %590 = vmatpush1.bf16.msra.mxu0 (!%p1871_p11), %v2206_v4  ;;  %v477_v18 = vld [vmem:[#allocation6 + $0x8] sm:$0xff] (!%p1871_p11)  ;;  %v2597_v20 = vmov (!%p1871_p11), -inf   ;;  %v2598_v21 = vmov (!%p1871_p11), 0.0   ;;  %v498_v23 = vshrl.u32 (!%p1871_p11), %v497_v22, 7  ;;  %v495_v25 = vld [vmem:[%s3082_s3] sm:$0x3] (!%p1871_p11) }
  0xc8   : > { %591 = vmatprep.subr.bf16.mxu0 (!%p1871_p11), %v2207_v5  ;;  %v478_v19 = vpack.c.bf16 (!%p1871_p11), %v477_v18, %v476_v17  ;;  %649 = vst.msk [vmem:[#allocation3] sm:$0xff] (!%p1871_p11), %vm648_vm0, %v2597_v20  ;;  %650 = vst.msk [vmem:[#allocation3 + $0x8] sm:$0xff] (!%p1871_p11), %vm648_vm0, %v2597_v20 }
  0xc9   : > { %651 = vst.msk [vmem:[#allocation3 + $0x10] sm:$0xff] %vm648_vm0, %v2597_v20  ;;  %652 = vst.msk [vmem:[#allocation3 + $0x18] sm:$0xff] %vm648_vm0, %v2597_v20  ;;  %v499_v24 = vsub.s32 0, %v498_v23  ;;  %v503_v26 = vsub.s32 1, %v498_v23 }
  0xca   : > { %653 = vst.msk [vmem:[#allocation4] sm:$0xff] %vm648_vm0, %v2598_v21  ;;  %654 = vst.msk [vmem:[#allocation4 + $0x8] sm:$0xff] %vm648_vm0, %v2598_v21 }
  0xcb   : > { %592 = vmatpush1.bf16.msra.mxu0 %v2209_v6  ;;  %655 = vst.msk [vmem:[#allocation4 + $0x10] sm:$0xff] %vm648_vm0, %v2598_v21  ;;  %656 = vst.msk [vmem:[#allocation4 + $0x18] sm:$0xff] %vm648_vm0, %v2598_v21  ;;  %v500_v27 = vrot.slane %v495_v25, %v499_v24  ;;  %v504_v28 = vrot.slane %v495_v25, %v503_v26 }
  0xcc   : > { %593 = vmatprep.subr.bf16.mxu0 %v2210_v7  ;;  %657 = vst [vmem:[#allocation5] sm:$0xff] %v2598_v21  ;;  %658 = vst [vmem:[#allocation5 + $0x8] sm:$0xff] %v2598_v21 }
  0xcd   : > { %659 = vst [vmem:[#allocation5 + $0x10] sm:$0xff] %v2598_v21  ;;  %660 = vst [vmem:[#allocation5 + $0x18] sm:$0xff] %v2598_v21 }
  0xcf   : > { %594 = vmatpush1.bf16.msra.mxu0 %v2212_v8 }
  0xd0   : > { %595 = vmatprep.subr.bf16.mxu0 %v2213_v9 }
  0xd3   : > { %596 = vmatpush1.bf16.msra.mxu0 %v2215_v10 }
  0xd4   : > { %597 = vmatprep.subr.bf16.mxu0 %v2216_v11 }
  0xd7   : > { %598 = vmatpush1.bf16.msra.mxu0 %v2218_v12 }
  0xd8   : > { %599 = vmatprep.subr.bf16.mxu0 %v2219_v13 }
  0xdb   : > { %600 = vmatpush1.bf16.msra.mxu0 %v2221_v14 }
  0xdc   : > { %601 = vmatprep.subr.bf16.mxu0 %v2222_v15 }
  0xdf   : > { %602 = vmatpush1.bf16.msra.mxu0 %v2224_v16 }
  0xe2   : > { %620 = vmatmul.mubr.bf16.vlgmr.msra.gmra.mrb[0].mxu0 %v478_v19 }
 0x1b5   : > { %v621_v29 = vpop.f32.mrb[0].mxu0 }
 0x1b6   : > { %v622_v30 = vadd.f32 %v621_v29, %v500_v27  ;;  %v623_v31 = vpop.f32.mrb[1].mxu0 }
 0x1b7   : > { %v624_v32 = vadd.f32 %v623_v31, %v504_v28  ;;  %v625_v33 = vpop.f32.mrb[2].mxu0 }
 0x1b8   : > { %v626_v34 = vadd.f32 %v625_v33, %v500_v27  ;;  %v627_v35 = vpop.f32.mrb[3].mxu0 }
 0x1b9   : > { %v1948_v36 = vpack.c.bf16 %v624_v32, %v622_v30  ;;  %v628_v37 = vadd.f32 %v627_v35, %v504_v28 }
 0x1bb   : > { %646 = vst [vmem:[#allocation2] sm:$0xff] %v1948_v36  ;;  %v1949_v38 = vpack.c.bf16 %v628_v37, %v626_v34 }
 0x1bd   : > { %647 = vst [vmem:[#allocation2 + $0x8] sm:$0xff] %v1949_v38 }
 0x1be PF: > { %v2227_v39 = vld [vmem:[#allocation12 + $0x4] ss:$8 sps:$4 sm:$0xff]   ;;  %v2229_v40 = vld [vmem:[#allocation12] ss:$8 sps:$4 sm:$0xff]   ;;  %v2599_v41 = vmov 0   ;;  %v2600_v11 = vmov 0.0   ;;  %v682_v12 = vlaneseq }
 0x1bf   : > { %804 = vmatprep.mubr.bf16.mxu0 %v2599_v41  ;;  %955 = vmatprep.mubr.bf16.mxu1 %v2599_v41  ;;  %v2230_v42 = vld [vmem:[#allocation12 + $0x14] ss:$8 sps:$4 sm:$0xff]   ;;  %v2232_v43 = vld [vmem:[#allocation12 + $0x10] ss:$8 sps:$4 sm:$0xff]   ;;  %v2233_v44 = vld [vmem:[#allocation12 + $0x24] ss:$8 sps:$4 sm:$0xff]  }
 0x1c0   : > { %772 = vmatprep.subr.bf16.mxu0 %v2227_v39  ;;  %2225 = vset.pattern.permute.xlu1 %v2599_v41  ;;  %v2235_v45 = vld [vmem:[#allocation12 + $0x20] ss:$8 sps:$4 sm:$0xff]   ;;  %v2236_v46 = vld [vmem:[#allocation12 + $0x34] ss:$8 sps:$4 sm:$0xff]   ;;  %v2238_v47 = vld [vmem:[#allocation12 + $0x30] ss:$8 sps:$4 sm:$0xff]  }
 0x1c1   : > { %773 = vmatpush1.bf16.msra.mxu0 %v2229_v40  ;;  %2226 = vset.pattern.permute.xlu0 %v2599_v41  ;;  %v2239_v48 = vld [vmem:[#allocation12 + $0x44] ss:$8 sps:$4 sm:$0xff]   ;;  %v2253_v50 = vld [vmem:[#allocation14] ss:$8 sps:$4 sm:$0xff]   ;;  %v2254_v51 = vld [vmem:[#allocation14 + $0x14] ss:$8 sps:$4 sm:$0xff]  }
 0x1c2   : > { %774 = vmatprep.subr.bf16.mxu0 %v2230_v42  ;;  %v2251_v49 = vld [vmem:[#allocation14 + $0x4] ss:$8 sps:$4 sm:$0xff]   ;;  %v2241_v52 = vld [vmem:[#allocation12 + $0x40] ss:$8 sps:$4 sm:$0xff]   ;;  %v2256_v53 = vld [vmem:[#allocation14 + $0x10] ss:$8 sps:$4 sm:$0xff]  }
 0x1c3   : > { %923 = vmatprep.subr.bf16.mxu1 %v2251_v49  ;;  %v2242_v54 = vld [vmem:[#allocation12 + $0x54] ss:$8 sps:$4 sm:$0xff]   ;;  %v2257_v55 = vld [vmem:[#allocation14 + $0x24] ss:$8 sps:$4 sm:$0xff]   ;;  %v2244_v56 = vld [vmem:[#allocation12 + $0x50] ss:$8 sps:$4 sm:$0xff]  }
 0x1c4   : > { %924 = vmatpush1.bf16.msra.mxu1 %v2253_v50  ;;  %v2259_v57 = vld [vmem:[#allocation14 + $0x20] ss:$8 sps:$4 sm:$0xff]   ;;  %v2245_v58 = vld [vmem:[#allocation12 + $0x64] ss:$8 sps:$4 sm:$0xff]   ;;  %v2260_v59 = vld [vmem:[#allocation14 + $0x34] ss:$8 sps:$4 sm:$0xff]  }
 0x1c5   : > { %775 = vmatpush1.bf16.msra.mxu0 %v2232_v43  ;;  %925 = vmatprep.subr.bf16.mxu1 %v2254_v51  ;;  %v2247_v60 = vld [vmem:[#allocation12 + $0x60] ss:$8 sps:$4 sm:$0xff]   ;;  %v2262_v61 = vld [vmem:[#allocation14 + $0x30] ss:$8 sps:$4 sm:$0xff]   ;;  %v2248_v62 = vld [vmem:[#allocation12 + $0x74] ss:$8 sps:$4 sm:$0xff]  }
 0x1c6   : > { %776 = vmatprep.subr.bf16.mxu0 %v2233_v44  ;;  %v2263_v63 = vld [vmem:[#allocation14 + $0x44] ss:$8 sps:$4 sm:$0xff]   ;;  %v2250_v0 = vld [vmem:[#allocation12 + $0x70] ss:$8 sps:$4 sm:$0xff]   ;;  %v2265_v3 = vld [vmem:[#allocation14 + $0x40] ss:$8 sps:$4 sm:$0xff]  }
 0x1c7   : > { %v661_v1 = vld [vmem:[%s420_s25] sm:$0xff]  ;;  %v662_v2 = vld [vmem:[%s420_s25 + $0x8] sm:$0xff]  ;;  %vm2601_vm1 = vmmov 0   ;;  %v2938_v13 = vshrl.u32 %v682_v12, 7  ;;  %s3114_s13 = sld [smem:[#allocation25_spill]]  ;;  %vm1123_vm2 = vcmask 1043456  }
 0x1c8   : > { %926 = vmatpush1.bf16.msra.mxu1 %v2256_v53  ;;  %v2266_v4 = vld [vmem:[#allocation14 + $0x54] ss:$8 sps:$4 sm:$0xff]   ;;  %v663_v5 = vpack.c.bf16 %v662_v2, %v661_v1  ;;  %v2268_v6 = vld [vmem:[#allocation14 + $0x50] ss:$8 sps:$4 sm:$0xff]   ;;  %v2269_v7 = vld [vmem:[#allocation14 + $0x64] ss:$8 sps:$4 sm:$0xff]  }
 0x1c9   : > { %777 = vmatpush1.bf16.msra.mxu0 %v2235_v45  ;;  %927 = vmatprep.subr.bf16.mxu1 %v2257_v55  ;;  %v2271_v8 = vld [vmem:[#allocation14 + $0x60] ss:$8 sps:$4 sm:$0xff]   ;;  %v2272_v9 = vld [vmem:[#allocation14 + $0x74] ss:$8 sps:$4 sm:$0xff]   ;;  %v2274_v10 = vld [vmem:[#allocation14 + $0x70] ss:$8 sps:$4 sm:$0xff]  }
 0x1ca   : > { %778 = vmatprep.subr.bf16.mxu0 %v2236_v46  ;;  %v684_v14 = vsub.s32 0, %v2938_v13  ;;  %v2944_v15 = vld [vmem:[%s3084_s5] sm:$0x3]  ;;  %v688_v26 = vsub.s32 1, %v2938_v13  ;;  %v975_v30 = vld [vmem:[#allocation2 + $0x8] sm:$0xf] }
 0x1cb   : > { %v974_v27 = vld [vmem:[#allocation2] sm:$0xf]  ;;  %vm1058_vm3 = vcmask 64512   ;;  %vm1101_vm4 = vcmask 7168   ;;  %p1926_p13 = scmp.ne.s32.totalorder %s2575_s16, 1 }
 0x1cc   : > { %928 = vmatpush1.bf16.msra.mxu1 %v2259_v57  ;;  %v685_v16 = vrot.slane %v2944_v15, %v684_v14  ;;  %v2971_v57 = vld [vmem:[#allocation3] sm:$0xff]  ;;  %vm2604_vm5 = vmmov (!%p1926_p13), 0   ;;  %s3115_s7 = sld [smem:[#allocation26_spill]] (!%p1926_p13) }
 0x1cd   : > { %779 = vmatpush1.bf16.msra.mxu0 %v2238_v47  ;;  %929 = vmatprep.subr.bf16.mxu1 %v2260_v59  ;;  %v831_v25 = vld [vmem:[%s3114_s13] sm:$0x3] }
 0x1ce   : > { %780 = vmatprep.subr.bf16.mxu0 %v2239_v48  ;;  %v836_v28 = vrot.slane %v831_v25, %v684_v14  ;;  %v840_v29 = vrot.slane %v831_v25, %v688_v26 }
 0x1d0   : > { %930 = vmatpush1.bf16.msra.mxu1 %v2262_v61 }
 0x1d1   : > { %781 = vmatpush1.bf16.msra.mxu0 %v2241_v52  ;;  %931 = vmatprep.subr.bf16.mxu1 %v2263_v63 }
 0x1d2   : > { %782 = vmatprep.subr.bf16.mxu0 %v2242_v54 }
 0x1d4   : > { %932 = vmatpush1.bf16.msra.mxu1 %v2265_v3 }
 0x1d5   : > { %783 = vmatpush1.bf16.msra.mxu0 %v2244_v56  ;;  %933 = vmatprep.subr.bf16.mxu1 %v2266_v4 }
 0x1d6   : > { %784 = vmatprep.subr.bf16.mxu0 %v2245_v58 }
 0x1d8   : > { %934 = vmatpush1.bf16.msra.mxu1 %v2268_v6 }
 0x1d9   : > { %785 = vmatpush1.bf16.msra.mxu0 %v2247_v60  ;;  %935 = vmatprep.subr.bf16.mxu1 %v2269_v7  ;;  %v2976_v60 = vld [vmem:[#allocation3 + $0x8] sm:$0xff]  ;;  %v689_v7 = vrot.slane %v2944_v15, %v688_v26  ;;  %v1219_v15 = vld [vmem:[#allocation2 + $0x4] sm:$0xf] }
 0x1da   : > { %786 = vmatprep.subr.bf16.mxu0 %v2248_v62 }
 0x1dc   : > { %936 = vmatpush1.bf16.msra.mxu1 %v2271_v8 }
 0x1dd   : > { %787 = vmatpush1.bf16.msra.mxu0 %v2250_v0  ;;  %937 = vmatprep.subr.bf16.mxu1 %v2272_v9 }
 0x1de   : > { %1984 = vmatprep.subr.bf16.mxu0 %v2600_v11 }
 0x1e0   : > { %805 = vmatmul.mubr.bf16.vlgmr.msra.gmra.mrb[0].mxu0 %v663_v5  ;;  %938 = vmatpush1.bf16.msra.mxu1 %v2274_v10 }
 0x1e1   : > { %1990 = vmatprep.subr.bf16.mxu1 %v2600_v11  ;;  %1986 = vmatprep.mubr.msk.bf16.mxu0 %vm2601_vm1, %v2600_v11 }
 0x1e3   : > { %956 = vmatmul.mubr.bf16.vlgmr.msra.gmra.mrb[0].mxu1 %v663_v5 }
 0x1e4   : > { %1992 = vmatprep.mubr.msk.bf16.mxu1 %vm2601_vm1, %v2600_v11 }
 0x2b3   : > { %v806_v17 = vpop.f32.mrb[0].mxu0 }
 0x2b4   : > { %v807_v18 = vadd.f32 %v806_v17, %v685_v16  ;;  %v2947_v19 = vpop.f32.mrb[1].mxu0 }
 0x2b5   : > { %v810_v20 = vpop.f32.mrb[2].mxu0  ;;  %v809_v8 = vadd.f32 %v2947_v19, %v689_v7 }
 0x2b6   : > { %v966_v21 = vpack.c.bf16 %v807_v18, %v807_v18  ;;  %v811_v22 = vadd.f32 %v810_v20, %v685_v16  ;;  %v2949_v23 = vpop.f32.mrb[3].mxu0  ;;  %v957_v31 = vpop.f32.mrb[0].mxu1  ;;  %v1220_v18 = vld [vmem:[#allocation2 + $0xc] sm:$0xf] }
 0x2b7   : > { %v958_v32 = vadd.f32 %v957_v31, %v836_v28  ;;  %v959_v33 = vpop.f32.mrb[1].mxu1  ;;  %v967_v12 = vpack.c.bf16 %v809_v8, %v809_v8  ;;  %v813_v14 = vadd.f32 %v2949_v23, %v689_v7  ;;  %v1104_v7 = vld [vmem:[#allocation5] sm:$0xff] }
 0x2b8   : > { %v968_v24 = vpack.c.bf16 %v811_v22, %v811_v22  ;;  %1985 = vmatpush3.bf16.xpose.msra.mxu0 %v966_v21  ;;  %v960_v34 = vadd.f32 %v959_v33, %v840_v29  ;;  %v961_v35 = vpop.f32.mrb[2].mxu1 }
 0x2b9   : > { %1996 = vmatprep.subr.bf16.mxu0 %v2600_v11  ;;  %v970_v36 = vpack.c.bf16 %v958_v32, %v958_v32  ;;  %v962_v37 = vadd.f32 %v961_v35, %v836_v28  ;;  %v963_v38 = vpop.f32.mrb[3].mxu1  ;;  %v969_v13 = vpack.c.bf16 %v813_v14, %v813_v14 }
 0x2ba   : > { %1991 = vmatpush3.bf16.xpose.msra.mxu1 %v968_v24  ;;  %v971_v39 = vpack.c.bf16 %v960_v34, %v960_v34  ;;  %v964_v40 = vadd.f32 %v963_v38, %v840_v29 }
 0x2bb   : > { %2002 = vmatprep.subr.bf16.mxu1 %v2600_v11  ;;  %v1125_v41 = vsel %vm1123_vm2, %v970_v36, 0  ;;  %v972_v42 = vpack.c.bf16 %v962_v37, %v962_v37  ;;  %v1302_v36 = vld [vmem:[#allocation3 + $0x10] sm:$0xff] }
 0x2bc   : > { %v1370_v43 = vsel %vm1123_vm2, %v971_v39, 0  ;;  %v973_v44 = vpack.c.bf16 %v964_v40, %v964_v40  ;;  %v1303_v39 = vld [vmem:[#allocation3 + $0x18] sm:$0xff] }
 0x2bd   : > { %v1171_v45 = vsel %vm1123_vm2, %v972_v42, 0 }
 0x2be   : > { %v1416_v46 = vsel %vm1123_vm2, %v973_v44, 0 }
 0x2bf   : > { %1987 = vmatmul.mubr.bf16.vlgmr.msra.gmra.mrb[4].mxu0 %v974_v27 }
 0x2c0   : > { %1998 = vmatprep.mubr.msk.bf16.mxu0 %vm2601_vm1, %v2600_v11  ;;  %1997 = vmatpush3.bf16.msra.mxu0 %v1125_v41 }
 0x2c1   : > { %1993 = vmatmul.mubr.bf16.vlgmr.msra.gmra.mrb[4].mxu1 %v975_v30  ;;  %2008 = vmatprep.subr.bf16.mxu0 %v2600_v11 }
 0x2c2   : > { %2004 = vmatprep.mubr.msk.bf16.mxu1 %vm2601_vm1, %v2600_v11  ;;  %2003 = vmatpush3.bf16.msra.mxu1 %v1171_v45 }
 0x2c3   : > { %2014 = vmatprep.subr.bf16.mxu1 %v2600_v11 }
 0x392   : > { %v1010_v47 = vpop.f32.mrb[4].mxu0 }
 0x393   : > { %v1988_v48 = vpop.f32.mrb[5].mxu0  ;;  %v1059_v49 = vsel %vm1058_vm3, %v1010_v47, -inf }
 0x394   : > { %v1050_v50 = vpop.f32.mrb[4].mxu1  ;;  %1060 = vmax.xlane.f32.xlu0 %v1059_v49  ;;  %v1013_v51 = vpop.f32.mrb[6].mxu0 }
 0x395   : > { %v1989_v52 = vpop.f32.mrb[7].mxu0  ;;  %v1994_v53 = vpop.f32.mrb[5].mxu1  ;;  %v1062_v54 = vsel %vm1058_vm3, %v1050_v50, -inf }
 0x396   : > { %v1053_v55 = vpop.f32.mrb[6].mxu1 }
 0x397   : > { %v1995_v56 = vpop.f32.mrb[7].mxu1 }
 0x398   : > { %1063 = vmax.xlane.f32.xlu0 %v1062_v54 }
 0x421   : > { %v1061_v58 = vpop.xlane.xlu0 %1060 }
 0x422   : > { %v2974_v59 = vmax.f32 %v2971_v57, %v1061_v58 }
 0x424   : > { %v1067_v61 = vsub.f32 %v2971_v57, %v2974_v59  ;;  %1217 = vst.msk [vmem:[#allocation3] sm:$0xff] %vm1101_vm4, %v2974_v59  ;;  %1075 = vperm.xlu1 %2225, %v2974_v59  }
 0x425   : > { %v1064_v62 = vpop.xlane.xlu0 %1063 }
 0x426   : > { %v2984_v63 = vmax.f32 %v2976_v60, %v1064_v62  ;;  %v1069_v44 = vmul.f32 1.442695, %v1067_v61 }
 0x428   : > { %v1068_v0 = vsub.f32 %v2976_v60, %v2984_v63  ;;  %1218 = vst.msk [vmem:[#allocation3 + $0x8] sm:$0xff] %vm1101_vm4, %v2984_v63  ;;  %1080 = vperm.xlu1 %2225, %v2984_v63  }
 0x4a3   : > { %v1076_v1 = vpop.permute.xlu1 %1075 }
 0x4a4   : > { %v1083_v2 = vsub.f32 %v1010_v47, %v1076_v1  ;;  %v1089_v1 = vld [vmem:[#allocation4] sm:$0xff] }
 0x4a6   : > { %v1085_v3 = vmul.f32 1.442695, %v1083_v2 }
 0x4a7   : > { %v1081_v4 = vpop.permute.xlu1 %1080 }
 0x4a8   : > { %2275 = vpow2.f32 %v1085_v3  ;;  %v1084_v5 = vsub.f32 %v1050_v50, %v1081_v4 }
 0x4aa   : > { %v1087_v6 = vmul.f32 1.442695, %v1084_v5 }
 0x4ac   : > { %2277 = vpow2.f32 %v1087_v6  ;;  %v1090_v6 = vld [vmem:[#allocation4 + $0x8] sm:$0xff] }
 0x4ad   : > { %2279 = vpow2.f32 %v1069_v44 }
 0x4b2   : > { %v2276_v9 = vpop.eup %2275 }
 0x4b3   : > { %v1118_v10 = vpack.c.bf16 %v2276_v9, %v2276_v9 }
 0x4b5   : > { %1999 = vmatmul.mubr.msk.bf16.vlgmr.msra.gmra.mrb[8].mxu0 %vm1058_vm3, %v1118_v10 }
 0x4b6   : > { %v2278_v16 = vpop.eup %2277  ;;  %2009 = vmatpush3.bf16.xpose.msra.mxu0 %v967_v12  ;;  %2010 = vmatprep.mubr.msk.bf16.mxu0 %vm2601_vm1, %v2600_v11 }
 0x4b7   : > { %v1119_v17 = vpack.c.bf16 %v2278_v16, %v2278_v16  ;;  %2020 = vmatprep.subr.bf16.mxu0 %v2600_v11  ;;  %v1096_v45 = vsel %vm1058_vm3, %v2278_v16, 0.0  ;;  %v2280_v49 = vpop.eup %2279 }
 0x4b8   : > { %v1091_v3 = vmul.f32 %v2280_v49, %v1089_v1  ;;  %v2306_v1 = vld [vmem:[#allocation15 + $0x30] sm:$0xff] (!%p1926_p13)  }
 0x4b9   : > { %2005 = vmatmul.mubr.msk.bf16.vlgmr.msra.gmra.mrb[8].mxu1 %vm1058_vm3, %v1119_v17  ;;  %v1105_v17 = vld [vmem:[#allocation5 + $0x8] sm:$0xff] }
 0x4ba   : > { %2015 = vmatpush3.bf16.xpose.msra.mxu1 %v969_v13  ;;  %2016 = vmatprep.mubr.msk.bf16.mxu1 %vm2601_vm1, %v2600_v11 }
 0x4bb   : > { %2026 = vmatprep.subr.bf16.mxu1 %v2600_v11 }
 0x4bd   : > { %2011 = vmatmul.mubr.bf16.vlgmr.msra.gmra.mrb[12].mxu0 %v1219_v15 }
 0x4be   : > { %2021 = vmatpush3.bf16.msra.mxu0 %v1370_v43  ;;  %2022 = vmatprep.mubr.msk.bf16.mxu0 %vm2601_vm1, %v2600_v11  ;;  %v1093_v43 = vsel %vm1058_vm3, %v2276_v9, 0.0 }
 0x4c1   : > { %2017 = vmatmul.mubr.bf16.vlgmr.msra.gmra.mrb[12].mxu1 %v1220_v18 }
 0x4c2   : > { %2027 = vmatpush3.bf16.msra.mxu1 %v1416_v46  ;;  %2028 = vmatprep.mubr.msk.bf16.mxu1 %vm2601_vm1, %v2600_v11  ;;  %v1071_v46 = vmul.f32 1.442695, %v1068_v0 }
 0x4c4   : > { %2281 = vpow2.f32 %v1071_v46 }
 0x4ce   : > { %v2282_v50 = vpop.eup %2281 }
 0x4cf   : > { %v1092_v9 = vmul.f32 %v2282_v50, %v1090_v6 }
 0x588   : > { %v3008_v19 = vpop.f32.mrb[8].mxu0 }
 0x589   : > { %v2000_v20 = vpop.f32.mrb[9].mxu0 }
 0x58a   : > { %v1164_v21 = vpop.f32.mrb[10].mxu0  ;;  %v1335_v20 = vld [vmem:[#allocation4 + $0x10] sm:$0xff] }
 0x58b   : > { %v2001_v22 = vpop.f32.mrb[11].mxu0 }
 0x58c   : > { %v3010_v23 = vpop.f32.mrb[8].mxu1 }
 0x58d   : > { %v2006_v24 = vpop.f32.mrb[9].mxu1 }
 0x58e   : > { %v1210_v25 = vpop.f32.mrb[10].mxu1  ;;  %v1336_v24 = vld [vmem:[#allocation4 + $0x18] sm:$0xff] }
 0x58f   : > { %v2007_v26 = vpop.f32.mrb[11].mxu1 }
 0x590   : > { %v1255_v27 = vpop.f32.mrb[12].mxu0 }
 0x591   : > { %v1304_v28 = vsel %vm1058_vm3, %v1255_v27, -inf  ;;  %v2012_v29 = vpop.f32.mrb[13].mxu0 }
 0x592   : > { %1305 = vmax.xlane.f32.xlu0 %v1304_v28  ;;  %v1258_v30 = vpop.f32.mrb[14].mxu0 }
 0x593   : > { %v2013_v31 = vpop.f32.mrb[15].mxu0 }
 0x594   : > { %v1295_v32 = vpop.f32.mrb[12].mxu1  ;;  %v1351_v31 = vld [vmem:[#allocation5 + $0x18] sm:$0xff] }
 0x595   : > { %v2018_v33 = vpop.f32.mrb[13].mxu1  ;;  %v1307_v11 = vsel %vm1058_vm3, %v1295_v32, -inf }
 0x596   : > { %1308 = vmax.xlane.f32.xlu1 %v1307_v11  ;;  %v1298_v34 = vpop.f32.mrb[14].mxu1 }
 0x597   : > { %v2019_v35 = vpop.f32.mrb[15].mxu1 }
 0x61f   : > { %v1306_v37 = vpop.xlane.xlu0 %1305 }
 0x620   : > { %v1310_v38 = vmax.f32 %v1302_v36, %v1306_v37 }
 0x622   : > { %1462 = vst.msk [vmem:[#allocation3 + $0x10] sm:$0xff] %vm1101_vm4, %v1310_v38  ;;  %1320 = vperm.xlu0 %2226, %v1310_v38   ;;  %v1312_v47 = vsub.f32 %v1302_v36, %v1310_v38 }
 0x623   : > { %v1309_v40 = vpop.xlane.xlu1 %1308 }
 0x624   : > { %v1311_v41 = vmax.f32 %v1303_v39, %v1309_v40  ;;  %v1314_v48 = vmul.f32 1.442695, %v1312_v47  ;;  %v2603_v47 = vmov (!%p1926_p13), 0.0  }
 0x625   : > { %2032 = vmatprep.subr.bf16.mxu0 (!%p1926_p13), %v2603_v47  ;;  %2052 = vmatprep.subr.bf16.mxu1 (!%p1926_p13), %v2603_v47 }
 0x626   : > { %v1313_v42 = vsub.f32 %v1303_v39, %v1311_v41  ;;  %1463 = vst.msk [vmem:[#allocation3 + $0x18] sm:$0xff] %vm1101_vm4, %v1311_v41  ;;  %1325 = vperm.xlu1 %2225, %v1311_v41   ;;  %2283 = vpow2.f32 %v1314_v48  ;;  %v2293_v48 = vld [vmem:[#allocation15 + $0x40] sm:$0xff] (!%p1926_p13)  }
 0x628   : > { %v1316_v0 = vmul.f32 1.442695, %v1313_v42 }
 0x630   : > { %v2284_v51 = vpop.eup %2283 }
 0x631   : > { %v1337_v21 = vmul.f32 %v2284_v51, %v1335_v20 }
 0x641   : > { %1094 = vadd.xlane.f32.xlu0 %v1093_v43 }
 0x64a   : > { %1097 = vadd.xlane.f32.xlu1 %v1096_v45  ;;  %v2602_v45 = vmov (!%p1926_p13), 0  }
 0x657   : > { %1108 = vperm.xlu0 %2226, %v2280_v49   ;;  %v2294_v49 = vld [vmem:[#allocation15] sm:$0xff] (!%p1926_p13)  }
 0x65b   : > { %1113 = vperm.xlu1 %2225, %v2282_v50   ;;  %v2295_v50 = vld [vmem:[#allocation15 + $0x48] sm:$0xff] (!%p1926_p13)  }
 0x65f   : > { %1354 = vperm.xlu1 %2225, %v2284_v51   ;;  %v2296_v51 = vld [vmem:[#allocation15 + $0x8] sm:$0xff] (!%p1926_p13)  }
 0x663   : > { %2292 = vset.pattern.permute.xlu1 (!%p1926_p13), %v2602_v45 }
 0x6a1   : > { %v1321_v52 = vpop.permute.xlu0 %1320 }
 0x6a2   : > { %v1328_v53 = vsub.f32 %v1255_v27, %v1321_v52  ;;  %v2297_v52 = vld [vmem:[#allocation15 + $0x50] sm:$0xff] (!%p1926_p13)  }
 0x6a4   : > { %v1330_v54 = vmul.f32 1.442695, %v1328_v53  ;;  %v2298_v53 = vld [vmem:[#allocation15 + $0x10] sm:$0xff] (!%p1926_p13)  }
 0x6a5   : > { %v1326_v55 = vpop.permute.xlu1 %1325 }
 0x6a6   : > { %2285 = vpow2.f32 %v1330_v54  ;;  %v1329_v56 = vsub.f32 %v1295_v32, %v1326_v55 }
 0x6a8   : > { %v1332_v57 = vmul.f32 1.442695, %v1329_v56  ;;  %v2299_v56 = vld [vmem:[#allocation15 + $0x58] sm:$0xff] (!%p1926_p13)  }
 0x6aa   : > { %2287 = vpow2.f32 %v1332_v57 }
 0x6ab   : > { %2289 = vpow2.f32 %v1316_v0  ;;  %v2305_v0 = vld [vmem:[#allocation15 + $0x70] sm:$0xff] (!%p1926_p13)  }
 0x6b0   : > { %v2286_v58 = vpop.eup %2285 }
 0x6b1   : > { %v1339_v59 = vsel %vm1058_vm3, %v2286_v58, 0.0  ;;  %v1364_v60 = vpack.c.bf16 %v2286_v58, %v2286_v58  ;;  %v2300_v58 = vld [vmem:[#allocation15 + $0x18] sm:$0xff] (!%p1926_p13)  }
 0x6b2   : > { %1340 = vadd.xlane.f32.xlu0 %v1339_v59 }
 0x6b3   : > { %2023 = vmatmul.mubr.msk.bf16.vlgmr.msra.gmra.mrb[16].mxu0 %vm1058_vm3, %v1364_v60  ;;  %v2301_v60 = vld [vmem:[#allocation15 + $0x60] sm:$0xff] (!%p1926_p13)  }
 0x6b4   : > { %v2288_v61 = vpop.eup %2287  ;;  %2033 = vmatpush3.bf16.msra.mxu0 (!%p1926_p13), %v2293_v48  ;;  %2048 = vmatprep.mubr.msk.bf16.mxu0 (!%p1926_p13), %vm2604_vm5, %v2603_v47 }
 0x6b5   : > { %v1342_v62 = vsel %vm1058_vm3, %v2288_v61, 0.0  ;;  %v1365_v63 = vpack.c.bf16 %v2288_v61, %v2288_v61  ;;  %v2290_v2 = vpop.eup %2289  ;;  %2034 = vmatprep.subr.bf16.mxu0 (!%p1926_p13), %v2603_v47  ;;  %v2302_v61 = vld [vmem:[#allocation15 + $0x20] sm:$0xff] (!%p1926_p13)  }
 0x6b6   : > { %1343 = vadd.xlane.f32.xlu0 %v1342_v62  ;;  %v1338_v26 = vmul.f32 %v2290_v2, %v1336_v24  ;;  %v2303_v62 = vld [vmem:[#allocation15 + $0x68] sm:$0xff] (!%p1926_p13)  }
 0x6b7   : > { %2029 = vmatmul.mubr.msk.bf16.vlgmr.msra.gmra.mrb[16].mxu1 %vm1058_vm3, %v1365_v63  ;;  %v2304_v63 = vld [vmem:[#allocation15 + $0x28] sm:$0xff] (!%p1926_p13)  }
 0x6b8   : > { %2053 = vmatpush3.bf16.msra.mxu1 (!%p1926_p13), %v2294_v49  ;;  %2035 = vmatpush3.bf16.msra.mxu0 (!%p1926_p13), %v2295_v50 }
 0x6b9   : > { %2054 = vmatprep.subr.bf16.mxu1 (!%p1926_p13), %v2603_v47  ;;  %2036 = vmatprep.subr.bf16.mxu0 (!%p1926_p13), %v2603_v47 }
 0x6ba   : > { %2068 = vmatprep.mubr.msk.bf16.mxu1 (!%p1926_p13), %vm2604_vm5, %v2603_v47 }
 0x6bc   : > { %2055 = vmatpush3.bf16.msra.mxu1 (!%p1926_p13), %v2296_v51  ;;  %2037 = vmatpush3.bf16.msra.mxu0 (!%p1926_p13), %v2297_v52 }
 0x6bd   : > { %2056 = vmatprep.subr.bf16.mxu1 (!%p1926_p13), %v2603_v47  ;;  %2038 = vmatprep.subr.bf16.mxu0 (!%p1926_p13), %v2603_v47 }
 0x6c0   : > { %2057 = vmatpush3.bf16.msra.mxu1 (!%p1926_p13), %v2298_v53  ;;  %2039 = vmatpush3.bf16.msra.mxu0 (!%p1926_p13), %v2299_v56 }
 0x6c1   : > { %2058 = vmatprep.subr.bf16.mxu1 (!%p1926_p13), %v2603_v47  ;;  %2040 = vmatprep.subr.bf16.mxu0 (!%p1926_p13), %v2603_v47 }
 0x6c4   : > { %2059 = vmatpush3.bf16.msra.mxu1 (!%p1926_p13), %v2300_v58  ;;  %2041 = vmatpush3.bf16.msra.mxu0 (!%p1926_p13), %v2301_v60 }
 0x6c5   : > { %2060 = vmatprep.subr.bf16.mxu1 (!%p1926_p13), %v2603_v47  ;;  %2042 = vmatprep.subr.bf16.mxu0 (!%p1926_p13), %v2603_v47 }
 0x6c8   : > { %2061 = vmatpush3.bf16.msra.mxu1 (!%p1926_p13), %v2302_v61  ;;  %2043 = vmatpush3.bf16.msra.mxu0 (!%p1926_p13), %v2303_v62 }
 0x6c9   : > { %2062 = vmatprep.subr.bf16.mxu1 (!%p1926_p13), %v2603_v47  ;;  %2044 = vmatprep.subr.bf16.mxu0 (!%p1926_p13), %v2603_v47 }
 0x6cc   : > { %1359 = vperm.xlu0 %2226, %v2290_v2   ;;  %2063 = vmatpush3.bf16.msra.mxu1 (!%p1926_p13), %v2304_v63  ;;  %v2307_v2 = vld [vmem:[#allocation15 + $0x78] sm:$0xff] (!%p1926_p13)  }
 0x6cd   : > { %2064 = vmatprep.subr.bf16.mxu1 (!%p1926_p13), %v2603_v47  ;;  %2045 = vmatpush3.bf16.msra.mxu0 (!%p1926_p13), %v2305_v0 }
 0x6ce   : > { %v1095_v4 = vpop.xlane.xlu0 %1094  ;;  %2046 = vmatprep.subr.bf16.mxu0 (!%p1926_p13), %v2603_v47 }
 0x6cf   : > { %v1099_v5 = vadd.f32 %v1095_v4, %v1091_v3  ;;  %v2308_v3 = vld [vmem:[#allocation15 + $0x38] sm:$0xff] (!%p1926_p13)  }
 0x6d0   : > { %2291 = vset.pattern.permute.xlu0 (!%p1926_p13), %v2602_v45  ;;  %2065 = vmatpush3.bf16.msra.mxu1 (!%p1926_p13), %v2306_v1 }
 0x6d1   : > { %1102 = vst.msk [vmem:[#allocation4] sm:$0xff] %vm1101_vm4, %v1099_v5  ;;  %2066 = vmatprep.subr.bf16.mxu1 (!%p1926_p13), %v2603_v47  ;;  %2047 = vmatpush3.bf16.msra.mxu0 (!%p1926_p13), %v2307_v2 }
 0x6d4   : > { %2067 = vmatpush3.bf16.msra.mxu1 (!%p1926_p13), %v2308_v3 }
 0x6d6   : > { %v1109_v8 = vpop.permute.xlu0 %1108 }
 0x6d7   : > { %v1116_v10 = vmul.f32 %v1109_v8, %v1104_v7  ;;  %v1098_v12 = vpop.xlane.xlu1 %1097 }
 0x6d8   : > { %v1100_v14 = vadd.f32 %v1098_v12, %v1092_v9  ;;  %v1470_v43 = vld [vmem:[#allocation4] sm:$0xff] (!%p1926_p13) }
 0x6d9   : > { %v1213_v16 = vadd.f32 %v3008_v19, %v1116_v10  ;;  %v1350_v19 = vld [vmem:[#allocation5 + $0x10] sm:$0xff] }
 0x6da   : > { %1103 = vst.msk [vmem:[#allocation4 + $0x8] sm:$0xff] %vm1101_vm4, %v1100_v14 }
 0x6db   : > { %1215 = vst [vmem:[#allocation5] sm:$0xff] %v1213_v16  ;;  %v1114_v13 = vpop.permute.xlu1 %1113 }
 0x6dc   : > { %v1117_v15 = vmul.f32 %v1114_v13, %v1105_v17 }
 0x6de   : > { %v1214_v18 = vadd.f32 %v3010_v23, %v1117_v15 }
 0x6df   : > { %v1355_v29 = vpop.permute.xlu1 %1354 }
 0x6e0   : > { %1216 = vst [vmem:[#allocation5 + $0x8] sm:$0xff] %v1214_v18  ;;  %v1362_v30 = vmul.f32 %v1355_v29, %v1350_v19 }
 0x6e1   : > { %v1471_v46 = vld [vmem:[#allocation4 + $0x8] sm:$0xff] (!%p1926_p13) }
 0x6e2   : > { %v1468_v8 = vld [vmem:[#allocation5] sm:$0xff] (!%p1926_p13) }
 0x6e7   : > { %v1469_v9 = vld [vmem:[#allocation5 + $0x8] sm:$0xff] (!%p1926_p13) }
 0x73f   : > { %v1341_v22 = vpop.xlane.xlu0 %1340 }
 0x740   : > { %v1345_v25 = vadd.f32 %v1341_v22, %v1337_v21  ;;  %v1943_v22 = vld [vmem:[%s3115_s7] ss:$0 sm:$0xff] (!%p1926_p13) }
 0x742   : > { %1347 = vst.msk [vmem:[#allocation4 + $0x10] sm:$0xff] %vm1101_vm4, %v1345_v25 }
 0x743   : > { %v1344_v27 = vpop.xlane.xlu0 %1343 }
 0x744   : > { %v1346_v28 = vadd.f32 %v1344_v27, %v1338_v26 }
 0x746   : > { %1348 = vst.msk [vmem:[#allocation4 + $0x18] sm:$0xff] %vm1101_vm4, %v1346_v28 }
 0x749   : > { %v1505_v42 = vld [vmem:[#allocation4 + $0x10] sm:$0xff] (!%p1926_p13) }
 0x74a   : > { %2309 = vrcp.f32 (!%p1926_p13), %v1505_v42 }
 0x74b   : > { %v1360_v32 = vpop.permute.xlu0 %1359  ;;  %2311 = vrcp.f32 (!%p1926_p13), %v1470_v43 }
 0x74c   : > { %v1363_v35 = vmul.f32 %v1360_v32, %v1351_v31 }
 0x74d   : > { %v1506_v44 = vld [vmem:[#allocation4 + $0x18] sm:$0xff] (!%p1926_p13) }
 0x74e   : > { %2313 = vrcp.f32 (!%p1926_p13), %v1506_v44 }
 0x74f   : > { %2315 = vrcp.f32 (!%p1926_p13), %v1471_v46 }
 0x754   : > { %v2310_v54 = vpop.eup (!%p1926_p13), %2309 }
 0x755   : > { %v2312_v55 = vpop.eup (!%p1926_p13), %2311  ;;  %1511 = vperm.xlu1 (!%p1926_p13), %2292, %v2310_v54  }
 0x756   : > { %1476 = vperm.xlu0 (!%p1926_p13), %2291, %v2312_v55  }
 0x758   : > { %v2314_v57 = vpop.eup (!%p1926_p13), %2313 }
 0x759   : > { %v2316_v59 = vpop.eup (!%p1926_p13), %2315  ;;  %1516 = vperm.xlu1 (!%p1926_p13), %2292, %v2314_v57  }
 0x75a   : > { %1481 = vperm.xlu0 (!%p1926_p13), %2291, %v2316_v59  }
 0x786   : > { %v1406_v33 = vpop.f32.mrb[16].mxu0 }
 0x787   : > { %v1458_v23 = vadd.f32 %v1406_v33, %v1362_v30  ;;  %v2024_v11 = vpop.f32.mrb[17].mxu0  ;;  %1467 = sbr.rel (%p1926_p13) target bundleno = 2233 (0x8b9), region = 92 }
 0x788   : > { %v1409_v34 = vpop.f32.mrb[18].mxu0 }
 0x789   : > { %1460 = vst [vmem:[#allocation5 + $0x10] sm:$0xff] %v1458_v23  ;;  %v2025_v36 = vpop.f32.mrb[19].mxu0 }
 0x78a   : > { %v1452_v37 = vpop.f32.mrb[16].mxu1 }
 0x78b   : > { %v1459_v38 = vadd.f32 %v1452_v37, %v1363_v35  ;;  %v2030_v39 = vpop.f32.mrb[17].mxu1 }
 0x78c   : > { %v1455_v40 = vpop.f32.mrb[18].mxu1 }
 0x78d   : > { %1461 = vst [vmem:[#allocation5 + $0x18] sm:$0xff] %v1459_v38  ;;  %v2031_v41 = vpop.f32.mrb[19].mxu1 }
 0x790   : > { %v1503_v6 = vld [vmem:[#allocation5 + $0x10] sm:$0xff] }
 0x794   : > { %v1504_v7 = vld [vmem:[#allocation5 + $0x18] sm:$0xff] }
 0x7d4   : > { %v1512_v4 = vpop.permute.xlu1 %1511 }
 0x7d5   : > { %v1477_v5 = vpop.permute.xlu0 %1476  ;;  %v1519_v12 = vmul.f32 %v1512_v4, %v1503_v6 }
 0x7d6   : > { %v1484_v17 = vmul.f32 %v1477_v5, %v1468_v8 }
 0x7d8   : > { %v1517_v10 = vpop.permute.xlu1 %1516 }
 0x7d9   : > { %v1520_v14 = vmul.f32 %v1517_v10, %v1504_v7  ;;  %v1482_v16 = vpop.permute.xlu0 %1481 }
 0x7da   : > { %v1485_v13 = vmul.f32 %v1482_v16, %v1469_v9 }
 0x7db   : > { %v1521_v15 = vpack.c.bf16 %v1520_v14, %v1519_v12 }
 0x7dc   : > { %v1486_v18 = vpack.c.bf16 %v1485_v13, %v1484_v17 }
 0x7dd   : > { %2049 = vmatmul.mubr.bf16.vlgmr.msra.gmra.mrb[0].mxu0 %v1521_v15 }
 0x7de   : > { %2069 = vmatmul.mubr.bf16.vlgmr.msra.gmra.mrb[0].mxu1 %v1486_v18 }
 0x8b0   : > { %v1620_v20 = vpop.f32.mrb[0].mxu0 }
 0x8b1   : > { %v1709_v21 = vpop.f32.mrb[0].mxu1  ;;  %v2050_v24 = vpop.f32.mrb[1].mxu0 }
 0x8b2   : > { %v1710_v25 = vadd.f32 %v1709_v21, %v1620_v20  ;;  %v2070_v26 = vpop.f32.mrb[1].mxu1  ;;  %v1623_v27 = vpop.f32.mrb[2].mxu0 }
 0x8b3   : > { %v1712_v28 = vpop.f32.mrb[2].mxu1  ;;  %v2051_v19 = vpop.f32.mrb[3].mxu0 }
 0x8b4   : > { %v1723_v29 = vadd.f32 %v1943_v22, %v1710_v25  ;;  %v1713_v30 = vadd.f32 %v1712_v28, %v1623_v27  ;;  %v2071_v31 = vpop.f32.mrb[3].mxu1 }
 0x8b6   : > { %1725 = vst [vmem:[#allocation17] sm:$0xff] %v1723_v29  ;;  %v1724_v32 = vadd.f32 %v1943_v22, %v1713_v30 }
 0x8b8   : > { %1726 = vst [vmem:[#allocation17 + $0x8] sm:$0xff] %v1724_v32 }
 0x8b9 PF: > { %p2129_p2 = scmp.eq.s32.totalorder %s2692_s19, 1  ;;  %s2605_s24 = smov [#allocation17]  }
 0x8ba   : > { %s1736_s23 = sshll.u32 %s2605_s24, 4  ;;  %s1737_s23 = int_to_ptr.vmem [resolvable:$true] %s1736_s23 }
 0x8bb   : > { %s2487_s26 = scalar_lea.vmem %s1737_s23, 256  ;;  %p2494_p6 = scmp.lt.s32.totalorder %s1737_s23, %s1737_s23 }
 0x8bc   : > { %p2488_p3 = scmp.ne.s32.totalorder %s1737_s23, %s2487_s26  ;;  %p2495_p7 = scmp.lt.s32.totalorder %s2487_s26, %s2487_s26 }
 0x8be   : > { %p2489_p12 = pnand %p2488_p3, %p2129_p2  ;;  %p2496_p9 = por %p2495_p7, %p2494_p6 }
 0x8c0   : > { %p2490_p0 = pneg %p2489_p12 }
 0x8c2   : > { %p2497_p1 = pnand %p2496_p9, %p2490_p0 }
 0x8c4   : > { %2500 = shalt.err (!%p2497_p1)
}
 0x8c5   : > { %s3116_s11 = sld [smem:[#allocation27_spill]] }
 0x8cb   : > { %s2501_s25 = scalar_lea.hbm %s3116_s11, 256 }
 0x8cc   : > { %p2502_p4 = scmp.ne.s32.totalorder %s3116_s11, %s2501_s25  ;;  %p2507_p10 = scmp.lt.u32.totalorder %s2501_s25, %s3116_s11 }
 0x8ce   : > { %p2503_p5 = pnand %p2502_p4, %p2129_p2 }
 0x8d0   : > { %p2504_p8 = pneg %p2503_p5 }
 0x8d2   : > { %p2509_p11 = pnand %p2507_p10, %p2504_p8 }
 0x8d4   : > { %2512 = shalt.err (!%p2509_p11)
}
 0x8d5   : > { %s2606_s9 = smov 128   ;;  %s2607_s2 = smov 8  }
 0x8d6   : > { %2095 = dma.vmem_to_hbm [thread:$0]  (%p2129_p2), %s1737_s23, 256, %s3116_s11, [#allocation8], %s2606_s9, %s2606_s9, %s2607_s2  }
 0x8d7   : > { %2558 = dma.done.wait (%p2129_p2), [#allocation8], 256  }
 0x8d8   : > { %2560 = vsyncadd (%p2129_p2), [#allocation8], 4294967040 }
 0x8d9 PF: > { %s27_s18 = sadd.s32 1, %s2583_s18   ;;  %s3117_s13 = smov %s2567_s14 }
 0x8da   : > { %p24_p13 = scmp.ge.s32.totalorder %s27_s18, 4   ;;  %s3118_s14 = smov %s2571_s15 }
 0x8db   : > { %s3119_s15 = smov %s2852_s29  ;;  %s3120_s16 = smov %s2579_s17 }
 0x8dc   : > { %s3121_s17 = smov %s3123_s22  ;;  %26 = sbr.rel (!%p24_p13) target bundleno = 13 (0xd), region = 131 }
 0x8e3   :  { %1752 = vsyncpa [#allocation7], 1 }
 0x8e4   :  { %1754 = vsyncpa [#allocation7 + $0x1], 1 }
 0x8e5   :  { %1755 = vsyncpa [#allocation10], 1 }
 0x8e6   :  { %1757 = vsyncpa [#allocation10 + $0x1], 1 }
 0x8e7   :  { %1758 = vsyncpa [#allocation13], 1 }
 0x8e8   :  { %1759 = vsyncpa [#allocation16], 1 }
 0x8e9   :  { %1760 = vsyncpa [#allocation8], 1 }
 0x8ea   :  { %1762 = vsyncpa [#allocation8 + $0x1], 1 }

</bundles_post_ra>
